<compile_context>
chip_gen: v5e
topology: v5e:2x2
jax: 0.10.0
libtpu: 0.0.40
codegen_flags: <defaults>
</compile_context>

<pallas_src>
import jax
import jax.numpy as jnp
from jax.experimental import pallas as pl
from jax.experimental.pallas import tpu as pltpu


# ----------------------------- Pallas kernel ------------------------------- #
def _downsample_conv_kernel(x_main_ref, x_next_ref, w_ref, b_ref, o_ref,
                            slab_ref):
    """One grid step = T output rows for ALL batch images.

    x_main_ref: (N, 2T, Wo+1, 2C) padded rows [2*T*i, 2*T*i + 2T); columns are
                folded as (half-col q, phase p, chan c): lane p*C+c = padded
                column 2*q + p, channel c.
    x_next_ref: (N, 1, Wo+1, 2C)  padded row 2*T*(i+1) (shared with next step)
    w_ref     : (9*C, Cp)         taps; row (kh*3+kw)*C + cin; Cout padded to Cp
    b_ref     : (1, Cp)           bias (padded)
    o_ref     : (N, T, Wo, Cp)    NHWC output rows (channels last -> lane dense)
    slab_ref  : (N, T, Wo, 9*C)   VMEM scratch for the fused im2col slab
    """
    nb, t, wo, cp = o_ref.shape
    c = x_main_ref.shape[-1] // 2
    k = 9 * c

    # Assemble the im2col slab with plain static-slice loads/stores.
    for r in range(t):                               # static unroll (T small)
        for kh in range(3):
            s = 2 * r + kh                           # padded row within block
            row = x_main_ref[:, s] if s < 2 * t else x_next_ref[:, 0]  # (N,Wo+1,2C)
            off = kh * 3 * c
            # kw=0 (even col 2j) and kw=1 (odd col 2j+1) are contiguous lanes.
            slab_ref[:, r, :, off:off + 2 * c] = row[:, 0:wo, :]
            # kw=2 is the next even column (2j+2).
            slab_ref[:, r, :, off + 2 * c:off + 3 * c] = row[:, 1:wo + 1, 0:c]

    # One fused GEMM for the whole step: M = N*T*Wo, K = 9*Cin.
    slab = slab_ref[...].reshape(nb * t * wo, k)
    acc = jnp.dot(slab, w_ref[...], preferred_element_type=jnp.float32)  # (M,Cp)
    out = acc.reshape(nb, t, wo, cp) + b_ref[...]
    o_ref[...] = out.astype(o_ref.dtype)


# ------------------------------ helpers ------------------------------------ #
def _vmem_cap_bytes():
    """Physical VMEM of the local chip (v5e/v6e: 128 MiB, v7x: 64 MiB/TC)."""
    try:
        cap = getattr(pltpu.get_tpu_info(), "vmem_capacity_bytes", None)
        if cap:
            return int(cap)
    except Exception:
        pass
    return 64 << 20  # conservative fallback = v7x per-TensorCore VMEM


def _pick_rows_per_step(h_out, per_row_bytes, budget_bytes):
    """Largest T dividing Ho that keeps >=2 grid steps and fits the budget."""
    best = 1
    for t in range(1, h_out + 1):
        if h_out % t:
            continue
        if h_out >= 2 and h_out // t < 2:
            continue
        if t * per_row_bytes > budget_bytes:
            continue
        best = t
    return best


# ------------------------------ wrapper ------------------------------------ #
@jax.jit
def downsample_forward(x_nchw, weight_oihw, bias):
    """Equivalent of Downsample(dim).forward(x) == nn.Conv2d(dim, dim, 3, 2, 1)(x)."""
    N, C, H, W = x_nchw.shape
    Cout, Cin, KH, KW = weight_oihw.shape
    assert (KH, KW) == (3, 3) and Cin == C

    Ho = (H + 1) // 2
    Wo = (W + 1) // 2
    Wh = Wo + 1                        # half-width of the (even-width) padded input
    Cp = ((Cout + 127) // 128) * 128   # lane-dense output channels
    # TODO(synk): for Cout << 128 most stored lanes are padding; a non-channels-
    # last output layout would cut store traffic for tiny dims like the demo.

    # --- JAX-side prep: one transpose+pad pass, then a FREE reshape folding the
    # even/odd column phase into the channel (lane) axis.  No strided gathers,
    # no im2col patch matrix in HBM.
    x_nhwc = jnp.transpose(x_nchw, (0, 2, 3, 1))                       # (N,H,W,C)
    pb = 2 * Ho - H                    # bottom pad: 0 if H even, 1 if H odd
    pr = 2 * Wh - W - 1                # right pad: 1 if W even, 2 if W odd
    xpad = jnp.pad(x_nhwc, ((0, 0), (1, pb), (1, pr), (0, 0)))         # (N,2Ho+1,2Wh,C)
    xr = xpad.reshape(N, 2 * Ho + 1, Wh, 2 * C)  # lane p*C+c == padded col 2q+p

    # Conv taps as (9*Cin, Cp): row index (kh*3+kw)*Cin + cin matches slab lanes.
    w2 = jnp.transpose(weight_oihw, (2, 3, 1, 0)).reshape(9 * Cin, Cout)
    w2 = jnp.pad(w2, ((0, 0), (0, Cp - Cout))).astype(jnp.float32)
    b2 = jnp.pad(bias, (0, Cp - Cout)).reshape(1, Cp).astype(jnp.float32)

    # --- choose T output rows per grid step (chip-aware VMEM budget) ---
    itemsize = 4
    cap = _vmem_cap_bytes()
    bytes_w = (9 * Cin * Cp + Cp) * itemsize
    per_row = (2 * (N * 2 * Wh * 2 * C + N * Wo * Cp)        # dbl-buffered blocks
               + N * Wo * 9 * C) * itemsize                  # slab scratch share
    budget = max(cap - 2 * bytes_w
                 - 2 * N * Wh * 2 * C * itemsize             # boundary-row block
                 - (16 << 20), 4 << 20)
    T = _pick_rows_per_step(Ho, per_row, budget)
    grid = (Ho // T,)

    in_specs = [
        # 2T padded rows for this step's T output rows.
        pl.BlockSpec((N, 2 * T, Wh, 2 * C), lambda i: (0, i, 0, 0)),
        # The one boundary row shared with the next step (row 2*T*(i+1)).
        pl.BlockSpec((N, 1, Wh, 2 * C), lambda i: (0, 2 * T * (i + 1), 0, 0)),
        pl.BlockSpec((9 * Cin, Cp), lambda i: (0, 0)),   # resident weights
        pl.BlockSpec((1, Cp), lambda i: (0, 0)),         # resident bias
    ]
    out_spec = pl.BlockSpec((N, T, Wo, Cp), lambda i: (0, i, 0, 0))

    bytes_in = 2 * N * (2 * T + 1) * Wh * 2 * C * itemsize   # dbl-buffered inputs
    bytes_out = 2 * N * T * Wo * Cp * itemsize               # dbl-buffered output
    bytes_slab = N * T * Wo * 9 * C * itemsize               # scratch (single)
    vmem_need = bytes_in + bytes_out + bytes_slab + 2 * bytes_w + (4 << 20)
    vmem_limit = int(min(max(vmem_need, 32 << 20), cap - (8 << 20)))
    # TODO(synk): for very large dim (f32 tap stack a large fraction of VMEM,
    # e.g. dim>=1024 on v7x) tile Cout/Cin on the grid (or use bf16 taps)
    # instead of keeping the full (9*Cin, Cp) weight stack resident.

    out_p = pl.pallas_call(
        _downsample_conv_kernel,
        out_shape=jax.ShapeDtypeStruct((N, Ho, Wo, Cp), x_nchw.dtype),
        grid_spec=pltpu.PrefetchScalarGridSpec(
            num_scalar_prefetch=0,
            grid=grid,
            in_specs=in_specs,
            out_specs=out_spec,
            scratch_shapes=[pltpu.VMEM((N, T, Wo, 9 * C), jnp.float32)],
        ),
        compiler_params=pltpu.CompilerParams(
            dimension_semantics=("parallel",),
            vmem_limit_bytes=vmem_limit,
        ),
    )(xr, xr, w2, b2)

    # Drop channel padding; restore NCHW for parity with the PyTorch module.
    # (Skip this transpose if the consumer can take NHWC directly.)
    return jnp.transpose(out_p[..., :Cout], (0, 3, 1, 2))


# ------------------------------- main --------------------------------------- #
if __name__ == "__main__":
    key = jax.random.PRNGKey(0)
    k_x, k_w, k_b = jax.random.split(key, 3)

    N, dim, H, W = 2, 4, 16, 16

    # Deterministic parameter init (PyTorch Conv2d default: U(-1/sqrt(fan_in), +)).
    fan_in = dim * 3 * 3
    bound = 1.0 / (fan_in ** 0.5)
    weight = jax.random.uniform(k_w, (dim, dim, 3, 3), jnp.float32, -bound, bound)
    bias = jax.random.uniform(k_b, (dim,), jnp.float32, -bound, bound)

    x = jax.random.normal(k_x, (N, dim, H, W), jnp.float32)

    out = downsample_forward(x, weight, bias)
    out = jax.block_until_ready(out)

    # Reference check against XLA's conv (same semantics as nn.Conv2d(dim,dim,3,2,1)).
    ref = jax.lax.conv_general_dilated(
        x, weight, window_strides=(2, 2), padding=((1, 1), (1, 1)),
        dimension_numbers=("NCHW", "OIHW", "NCHW"),
    ) + bias[None, :, None, None]

    assert out.shape == (N, dim, H // 2, W // 2), out.shape
    max_err = float(jnp.max(jnp.abs(out - ref)))
    assert max_err < 1e-4, max_err

    print("KERNEL_OK")
</pallas_src>

<mosaic_0001>
module attributes {stable_mosaic.version = 11 : i64} {
  func.func @_downsample_conv_kernel(%arg0: i32, %arg1: memref<2x8x9x8xf32, #tpu.memory_space<vmem>>, %arg2: memref<2x1x9x8xf32, #tpu.memory_space<vmem>>, %arg3: memref<36x128xf32, #tpu.memory_space<vmem>>, %arg4: memref<1x128xf32, #tpu.memory_space<vmem>>, %arg5: memref<2x4x8x128xf32, #tpu.memory_space<vmem>>, %arg6: memref<2x4x8x36xf32, #tpu.memory_space<vmem>>) attributes {dimension_semantics = [#tpu.dimension_semantics<parallel>], iteration_bounds = array<i64: 2>, scalar_prefetch = 0 : i64, scratch_operands = 1 : i64, tpu.core_type = #tpu.core_type<tc>, window_params = [{transform_indices = @transform_0, window_bounds = array<i64: 2, 8, 9, 8>}, {transform_indices = @transform_1, window_bounds = array<i64: 2, 1, 9, 8>}, {pipeline_mode = #tpu.pipeline_mode<synchronous>, transform_indices = @transform_2, window_bounds = array<i64: 36, 128>}, {pipeline_mode = #tpu.pipeline_mode<synchronous>, transform_indices = @transform_3, window_bounds = array<i64: 1, 128>}, {transform_indices = @transform_4, window_bounds = array<i64: 2, 4, 8, 128>}]} {
    %c0 = arith.constant 0 : index
    %c0_0 = arith.constant 0 : index
    %c0_1 = arith.constant 0 : index
    %c0_2 = arith.constant 0 : index
    %0 = vector.load %arg1[%c0, %c0_0, %c0_1, %c0_2] : memref<2x8x9x8xf32, #tpu.memory_space<vmem>>, vector<2x1x9x8xf32>
    %1 = vector.shape_cast %0 : vector<2x1x9x8xf32> to vector<2x9x8xf32>
    %2 = vector.extract_strided_slice %1 {offsets = [0, 0, 0], sizes = [2, 8, 8], strides = [1, 1, 1]} : vector<2x9x8xf32> to vector<2x8x8xf32>
    %c0_3 = arith.constant 0 : index
    %c0_4 = arith.constant 0 : index
    %c0_5 = arith.constant 0 : index
    %c0_6 = arith.constant 0 : index
    %3 = vector.load %arg6[%c0_3, %c0_4, %c0_5, %c0_6] : memref<2x4x8x36xf32, #tpu.memory_space<vmem>>, vector<2x1x8x8xf32>
    %4 = vector.shape_cast %3 : vector<2x1x8x8xf32> to vector<2x8x8xf32>
    %5 = vector.shape_cast %2 : vector<2x8x8xf32> to vector<2x1x8x8xf32>
    tpu.vector_store %arg6[%c0_3, %c0_4, %c0_5, %c0_6], %5 {strides = array<i32>} : memref<2x4x8x36xf32, #tpu.memory_space<vmem>>, vector<2x1x8x8xf32>,
    %6 = vector.extract_strided_slice %1 {offsets = [0, 1, 0], sizes = [2, 8, 4], strides = [1, 1, 1]} : vector<2x9x8xf32> to vector<2x8x4xf32>
    %c0_7 = arith.constant 0 : index
    %c0_8 = arith.constant 0 : index
    %c0_9 = arith.constant 0 : index
    %c8 = arith.constant 8 : index
    %7 = vector.load %arg6[%c0_7, %c0_8, %c0_9, %c8] : memref<2x4x8x36xf32, #tpu.memory_space<vmem>>, vector<2x1x8x4xf32>
    %8 = vector.shape_cast %7 : vector<2x1x8x4xf32> to vector<2x8x4xf32>
    %9 = vector.shape_cast %6 : vector<2x8x4xf32> to vector<2x1x8x4xf32>
    tpu.vector_store %arg6[%c0_7, %c0_8, %c0_9, %c8], %9 {strides = array<i32>} : memref<2x4x8x36xf32, #tpu.memory_space<vmem>>, vector<2x1x8x4xf32>,
    %c0_10 = arith.constant 0 : index
    %c1 = arith.constant 1 : index
    %c0_11 = arith.constant 0 : index
    %c0_12 = arith.constant 0 : index
    %10 = vector.load %arg1[%c0_10, %c1, %c0_11, %c0_12] : memref<2x8x9x8xf32, #tpu.memory_space<vmem>>, vector<2x1x9x8xf32>
    %11 = vector.shape_cast %10 : vector<2x1x9x8xf32> to vector<2x9x8xf32>
    %12 = vector.extract_strided_slice %11 {offsets = [0, 0, 0], sizes = [2, 8, 8], strides = [1, 1, 1]} : vector<2x9x8xf32> to vector<2x8x8xf32>
    %c0_13 = arith.constant 0 : index
    %c0_14 = arith.constant 0 : index
    %c0_15 = arith.constant 0 : index
    %c12 = arith.constant 12 : index
    %13 = vector.load %arg6[%c0_13, %c0_14, %c0_15, %c12] : memref<2x4x8x36xf32, #tpu.memory_space<vmem>>, vector<2x1x8x8xf32>
    %14 = vector.shape_cast %13 : vector<2x1x8x8xf32> to vector<2x8x8xf32>
    %15 = vector.shape_cast %12 : vector<2x8x8xf32> to vector<2x1x8x8xf32>
    tpu.vector_store %arg6[%c0_13, %c0_14, %c0_15, %c12], %15 {strides = array<i32>} : memref<2x4x8x36xf32, #tpu.memory_space<vmem>>, vector<2x1x8x8xf32>,
    %16 = vector.extract_strided_slice %11 {offsets = [0, 1, 0], sizes = [2, 8, 4], strides = [1, 1, 1]} : vector<2x9x8xf32> to vector<2x8x4xf32>
    %c0_16 = arith.constant 0 : index
    %c0_17 = arith.constant 0 : index
    %c0_18 = arith.constant 0 : index
    %c20 = arith.constant 20 : index
    %17 = vector.load %arg6[%c0_16, %c0_17, %c0_18, %c20] : memref<2x4x8x36xf32, #tpu.memory_space<vmem>>, vector<2x1x8x4xf32>
    %18 = vector.shape_cast %17 : vector<2x1x8x4xf32> to vector<2x8x4xf32>
    %19 = vector.shape_cast %16 : vector<2x8x4xf32> to vector<2x1x8x4xf32>
    tpu.vector_store %arg6[%c0_16, %c0_17, %c0_18, %c20], %19 {strides = array<i32>} : memref<2x4x8x36xf32, #tpu.memory_space<vmem>>, vector<2x1x8x4xf32>,
    %c0_19 = arith.constant 0 : index
    %c2 = arith.constant 2 : index
    %c0_20 = arith.constant 0 : index
    %c0_21 = arith.constant 0 : index
    %20 = vector.load %arg1[%c0_19, %c2, %c0_20, %c0_21] : memref<2x8x9x8xf32, #tpu.memory_space<vmem>>, vector<2x1x9x8xf32>
    %21 = vector.shape_cast %20 : vector<2x1x9x8xf32> to vector<2x9x8xf32>
    %22 = vector.extract_strided_slice %21 {offsets = [0, 0, 0], sizes = [2, 8, 8], strides = [1, 1, 1]} : vector<2x9x8xf32> to vector<2x8x8xf32>
    %c0_22 = arith.constant 0 : index
    %c0_23 = arith.constant 0 : index
    %c0_24 = arith.constant 0 : index
    %c24 = arith.constant 24 : index
    %23 = vector.load %arg6[%c0_22, %c0_23, %c0_24, %c24] : memref<2x4x8x36xf32, #tpu.memory_space<vmem>>, vector<2x1x8x8xf32>
    %24 = vector.shape_cast %23 : vector<2x1x8x8xf32> to vector<2x8x8xf32>
    %25 = vector.shape_cast %22 : vector<2x8x8xf32> to vector<2x1x8x8xf32>
    tpu.vector_store %arg6[%c0_22, %c0_23, %c0_24, %c24], %25 {strides = array<i32>} : memref<2x4x8x36xf32, #tpu.memory_space<vmem>>, vector<2x1x8x8xf32>,
    %26 = vector.extract_strided_slice %21 {offsets = [0, 1, 0], sizes = [2, 8, 4], strides = [1, 1, 1]} : vector<2x9x8xf32> to vector<2x8x4xf32>
    %c0_25 = arith.constant 0 : index
    %c0_26 = arith.constant 0 : index
    %c0_27 = arith.constant 0 : index
    %c32 = arith.constant 32 : index
    %27 = vector.load %arg6[%c0_25, %c0_26, %c0_27, %c32] : memref<2x4x8x36xf32, #tpu.memory_space<vmem>>, vector<2x1x8x4xf32>
    %28 = vector.shape_cast %27 : vector<2x1x8x4xf32> to vector<2x8x4xf32>
    %29 = vector.shape_cast %26 : vector<2x8x4xf32> to vector<2x1x8x4xf32>
    tpu.vector_store %arg6[%c0_25, %c0_26, %c0_27, %c32], %29 {strides = array<i32>} : memref<2x4x8x36xf32, #tpu.memory_space<vmem>>, vector<2x1x8x4xf32>,
    %c0_28 = arith.constant 0 : index
    %c2_29 = arith.constant 2 : index
    %c0_30 = arith.constant 0 : index
    %c0_31 = arith.constant 0 : index
    %30 = vector.load %arg1[%c0_28, %c2_29, %c0_30, %c0_31] : memref<2x8x9x8xf32, #tpu.memory_space<vmem>>, vector<2x1x9x8xf32>
    %31 = vector.shape_cast %30 : vector<2x1x9x8xf32> to vector<2x9x8xf32>
    %32 = vector.extract_strided_slice %31 {offsets = [0, 0, 0], sizes = [2, 8, 8], strides = [1, 1, 1]} : vector<2x9x8xf32> to vector<2x8x8xf32>
    %c0_32 = arith.constant 0 : index
    %c1_33 = arith.constant 1 : index
    %c0_34 = arith.constant 0 : index
    %c0_35 = arith.constant 0 : index
    %33 = vector.load %arg6[%c0_32, %c1_33, %c0_34, %c0_35] : memref<2x4x8x36xf32, #tpu.memory_space<vmem>>, vector<2x1x8x8xf32>
    %34 = vector.shape_cast %33 : vector<2x1x8x8xf32> to vector<2x8x8xf32>
    %35 = vector.shape_cast %32 : vector<2x8x8xf32> to vector<2x1x8x8xf32>
    tpu.vector_store %arg6[%c0_32, %c1_33, %c0_34, %c0_35], %35 {strides = array<i32>} : memref<2x4x8x36xf32, #tpu.memory_space<vmem>>, vector<2x1x8x8xf32>,
    %36 = vector.extract_strided_slice %31 {offsets = [0, 1, 0], sizes = [2, 8, 4], strides = [1, 1, 1]} : vector<2x9x8xf32> to vector<2x8x4xf32>
    %c0_36 = arith.constant 0 : index
    %c1_37 = arith.constant 1 : index
    %c0_38 = arith.constant 0 : index
    %c8_39 = arith.constant 8 : index
    %37 = vector.load %arg6[%c0_36, %c1_37, %c0_38, %c8_39] : memref<2x4x8x36xf32, #tpu.memory_space<vmem>>, vector<2x1x8x4xf32>
    %38 = vector.shape_cast %37 : vector<2x1x8x4xf32> to vector<2x8x4xf32>
    %39 = vector.shape_cast %36 : vector<2x8x4xf32> to vector<2x1x8x4xf32>
    tpu.vector_store %arg6[%c0_36, %c1_37, %c0_38, %c8_39], %39 {strides = array<i32>} : memref<2x4x8x36xf32, #tpu.memory_space<vmem>>, vector<2x1x8x4xf32>,
    %c0_40 = arith.constant 0 : index
    %c3 = arith.constant 3 : index
    %c0_41 = arith.constant 0 : index
    %c0_42 = arith.constant 0 : index
    %40 = vector.load %arg1[%c0_40, %c3, %c0_41, %c0_42] : memref<2x8x9x8xf32, #tpu.memory_space<vmem>>, vector<2x1x9x8xf32>
    %41 = vector.shape_cast %40 : vector<2x1x9x8xf32> to vector<2x9x8xf32>
    %42 = vector.extract_strided_slice %41 {offsets = [0, 0, 0], sizes = [2, 8, 8], strides = [1, 1, 1]} : vector<2x9x8xf32> to vector<2x8x8xf32>
    %c0_43 = arith.constant 0 : index
    %c1_44 = arith.constant 1 : index
    %c0_45 = arith.constant 0 : index
    %c12_46 = arith.constant 12 : index
    %43 = vector.load %arg6[%c0_43, %c1_44, %c0_45, %c12_46] : memref<2x4x8x36xf32, #tpu.memory_space<vmem>>, vector<2x1x8x8xf32>
    %44 = vector.shape_cast %43 : vector<2x1x8x8xf32> to vector<2x8x8xf32>
    %45 = vector.shape_cast %42 : vector<2x8x8xf32> to vector<2x1x8x8xf32>
    tpu.vector_store %arg6[%c0_43, %c1_44, %c0_45, %c12_46], %45 {strides = array<i32>} : memref<2x4x8x36xf32, #tpu.memory_space<vmem>>, vector<2x1x8x8xf32>,
    %46 = vector.extract_strided_slice %41 {offsets = [0, 1, 0], sizes = [2, 8, 4], strides = [1, 1, 1]} : vector<2x9x8xf32> to vector<2x8x4xf32>
    %c0_47 = arith.constant 0 : index
    %c1_48 = arith.constant 1 : index
    %c0_49 = arith.constant 0 : index
    %c20_50 = arith.constant 20 : index
    %47 = vector.load %arg6[%c0_47, %c1_48, %c0_49, %c20_50] : memref<2x4x8x36xf32, #tpu.memory_space<vmem>>, vector<2x1x8x4xf32>
    %48 = vector.shape_cast %47 : vector<2x1x8x4xf32> to vector<2x8x4xf32>
    %49 = vector.shape_cast %46 : vector<2x8x4xf32> to vector<2x1x8x4xf32>
    tpu.vector_store %arg6[%c0_47, %c1_48, %c0_49, %c20_50], %49 {strides = array<i32>} : memref<2x4x8x36xf32, #tpu.memory_space<vmem>>, vector<2x1x8x4xf32>,
    %c0_51 = arith.constant 0 : index
    %c4 = arith.constant 4 : index
    %c0_52 = arith.constant 0 : index
    %c0_53 = arith.constant 0 : index
    %50 = vector.load %arg1[%c0_51, %c4, %c0_52, %c0_53] : memref<2x8x9x8xf32, #tpu.memory_space<vmem>>, vector<2x1x9x8xf32>
    %51 = vector.shape_cast %50 : vector<2x1x9x8xf32> to vector<2x9x8xf32>
    %52 = vector.extract_strided_slice %51 {offsets = [0, 0, 0], sizes = [2, 8, 8], strides = [1, 1, 1]} : vector<2x9x8xf32> to vector<2x8x8xf32>
    %c0_54 = arith.constant 0 : index
    %c1_55 = arith.constant 1 : index
    %c0_56 = arith.constant 0 : index
    %c24_57 = arith.constant 24 : index
    %53 = vector.load %arg6[%c0_54, %c1_55, %c0_56, %c24_57] : memref<2x4x8x36xf32, #tpu.memory_space<vmem>>, vector<2x1x8x8xf32>
    %54 = vector.shape_cast %53 : vector<2x1x8x8xf32> to vector<2x8x8xf32>
    %55 = vector.shape_cast %52 : vector<2x8x8xf32> to vector<2x1x8x8xf32>
    tpu.vector_store %arg6[%c0_54, %c1_55, %c0_56, %c24_57], %55 {strides = array<i32>} : memref<2x4x8x36xf32, #tpu.memory_space<vmem>>, vector<2x1x8x8xf32>,
    %56 = vector.extract_strided_slice %51 {offsets = [0, 1, 0], sizes = [2, 8, 4], strides = [1, 1, 1]} : vector<2x9x8xf32> to vector<2x8x4xf32>
    %c0_58 = arith.constant 0 : index
    %c1_59 = arith.constant 1 : index
    %c0_60 = arith.constant 0 : index
    %c32_61 = arith.constant 32 : index
    %57 = vector.load %arg6[%c0_58, %c1_59, %c0_60, %c32_61] : memref<2x4x8x36xf32, #tpu.memory_space<vmem>>, vector<2x1x8x4xf32>
    %58 = vector.shape_cast %57 : vector<2x1x8x4xf32> to vector<2x8x4xf32>
    %59 = vector.shape_cast %56 : vector<2x8x4xf32> to vector<2x1x8x4xf32>
    tpu.vector_store %arg6[%c0_58, %c1_59, %c0_60, %c32_61], %59 {strides = array<i32>} : memref<2x4x8x36xf32, #tpu.memory_space<vmem>>, vector<2x1x8x4xf32>,
    %c0_62 = arith.constant 0 : index
    %c4_63 = arith.constant 4 : index
    %c0_64 = arith.constant 0 : index
    %c0_65 = arith.constant 0 : index
    %60 = vector.load %arg1[%c0_62, %c4_63, %c0_64, %c0_65] : memref<2x8x9x8xf32, #tpu.memory_space<vmem>>, vector<2x1x9x8xf32>
    %61 = vector.shape_cast %60 : vector<2x1x9x8xf32> to vector<2x9x8xf32>
    %62 = vector.extract_strided_slice %61 {offsets = [0, 0, 0], sizes = [2, 8, 8], strides = [1, 1, 1]} : vector<2x9x8xf32> to vector<2x8x8xf32>
    %c0_66 = arith.constant 0 : index
    %c2_67 = arith.constant 2 : index
    %c0_68 = arith.constant 0 : index
    %c0_69 = arith.constant 0 : index
    %63 = vector.load %arg6[%c0_66, %c2_67, %c0_68, %c0_69] : memref<2x4x8x36xf32, #tpu.memory_space<vmem>>, vector<2x1x8x8xf32>
    %64 = vector.shape_cast %63 : vector<2x1x8x8xf32> to vector<2x8x8xf32>
    %65 = vector.shape_cast %62 : vector<2x8x8xf32> to vector<2x1x8x8xf32>
    tpu.vector_store %arg6[%c0_66, %c2_67, %c0_68, %c0_69], %65 {strides = array<i32>} : memref<2x4x8x36xf32, #tpu.memory_space<vmem>>, vector<2x1x8x8xf32>,
    %66 = vector.extract_strided_slice %61 {offsets = [0, 1, 0], sizes = [2, 8, 4], strides = [1, 1, 1]} : vector<2x9x8xf32> to vector<2x8x4xf32>
    %c0_70 = arith.constant 0 : index
    %c2_71 = arith.constant 2 : index
    %c0_72 = arith.constant 0 : index
    %c8_73 = arith.constant 8 : index
    %67 = vector.load %arg6[%c0_70, %c2_71, %c0_72, %c8_73] : memref<2x4x8x36xf32, #tpu.memory_space<vmem>>, vector<2x1x8x4xf32>
    %68 = vector.shape_cast %67 : vector<2x1x8x4xf32> to vector<2x8x4xf32>
    %69 = vector.shape_cast %66 : vector<2x8x4xf32> to vector<2x1x8x4xf32>
    tpu.vector_store %arg6[%c0_70, %c2_71, %c0_72, %c8_73], %69 {strides = array<i32>} : memref<2x4x8x36xf32, #tpu.memory_space<vmem>>, vector<2x1x8x4xf32>,
    %c0_74 = arith.constant 0 : index
    %c5 = arith.constant 5 : index
    %c0_75 = arith.constant 0 : index
    %c0_76 = arith.constant 0 : index
    %70 = vector.load %arg1[%c0_74, %c5, %c0_75, %c0_76] : memref<2x8x9x8xf32, #tpu.memory_space<vmem>>, vector<2x1x9x8xf32>
    %71 = vector.shape_cast %70 : vector<2x1x9x8xf32> to vector<2x9x8xf32>
    %72 = vector.extract_strided_slice %71 {offsets = [0, 0, 0], sizes = [2, 8, 8], strides = [1, 1, 1]} : vector<2x9x8xf32> to vector<2x8x8xf32>
    %c0_77 = arith.constant 0 : index
    %c2_78 = arith.constant 2 : index
    %c0_79 = arith.constant 0 : index
    %c12_80 = arith.constant 12 : index
    %73 = vector.load %arg6[%c0_77, %c2_78, %c0_79, %c12_80] : memref<2x4x8x36xf32, #tpu.memory_space<vmem>>, vector<2x1x8x8xf32>
    %74 = vector.shape_cast %73 : vector<2x1x8x8xf32> to vector<2x8x8xf32>
    %75 = vector.shape_cast %72 : vector<2x8x8xf32> to vector<2x1x8x8xf32>
    tpu.vector_store %arg6[%c0_77, %c2_78, %c0_79, %c12_80], %75 {strides = array<i32>} : memref<2x4x8x36xf32, #tpu.memory_space<vmem>>, vector<2x1x8x8xf32>,
    %76 = vector.extract_strided_slice %71 {offsets = [0, 1, 0], sizes = [2, 8, 4], strides = [1, 1, 1]} : vector<2x9x8xf32> to vector<2x8x4xf32>
    %c0_81 = arith.constant 0 : index
    %c2_82 = arith.constant 2 : index
    %c0_83 = arith.constant 0 : index
    %c20_84 = arith.constant 20 : index
    %77 = vector.load %arg6[%c0_81, %c2_82, %c0_83, %c20_84] : memref<2x4x8x36xf32, #tpu.memory_space<vmem>>, vector<2x1x8x4xf32>
    %78 = vector.shape_cast %77 : vector<2x1x8x4xf32> to vector<2x8x4xf32>
    %79 = vector.shape_cast %76 : vector<2x8x4xf32> to vector<2x1x8x4xf32>
    tpu.vector_store %arg6[%c0_81, %c2_82, %c0_83, %c20_84], %79 {strides = array<i32>} : memref<2x4x8x36xf32, #tpu.memory_space<vmem>>, vector<2x1x8x4xf32>,
    %c0_85 = arith.constant 0 : index
    %c6 = arith.constant 6 : index
    %c0_86 = arith.constant 0 : index
    %c0_87 = arith.constant 0 : index
    %80 = vector.load %arg1[%c0_85, %c6, %c0_86, %c0_87] : memref<2x8x9x8xf32, #tpu.memory_space<vmem>>, vector<2x1x9x8xf32>
    %81 = vector.shape_cast %80 : vector<2x1x9x8xf32> to vector<2x9x8xf32>
    %82 = vector.extract_strided_slice %81 {offsets = [0, 0, 0], sizes = [2, 8, 8], strides = [1, 1, 1]} : vector<2x9x8xf32> to vector<2x8x8xf32>
    %c0_88 = arith.constant 0 : index
    %c2_89 = arith.constant 2 : index
    %c0_90 = arith.constant 0 : index
    %c24_91 = arith.constant 24 : index
    %83 = vector.load %arg6[%c0_88, %c2_89, %c0_90, %c24_91] : memref<2x4x8x36xf32, #tpu.memory_space<vmem>>, vector<2x1x8x8xf32>
    %84 = vector.shape_cast %83 : vector<2x1x8x8xf32> to vector<2x8x8xf32>
    %85 = vector.shape_cast %82 : vector<2x8x8xf32> to vector<2x1x8x8xf32>
    tpu.vector_store %arg6[%c0_88, %c2_89, %c0_90, %c24_91], %85 {strides = array<i32>} : memref<2x4x8x36xf32, #tpu.memory_space<vmem>>, vector<2x1x8x8xf32>,
    %86 = vector.extract_strided_slice %81 {offsets = [0, 1, 0], sizes = [2, 8, 4], strides = [1, 1, 1]} : vector<2x9x8xf32> to vector<2x8x4xf32>
    %c0_92 = arith.constant 0 : index
    %c2_93 = arith.constant 2 : index
    %c0_94 = arith.constant 0 : index
    %c32_95 = arith.constant 32 : index
    %87 = vector.load %arg6[%c0_92, %c2_93, %c0_94, %c32_95] : memref<2x4x8x36xf32, #tpu.memory_space<vmem>>, vector<2x1x8x4xf32>
    %88 = vector.shape_cast %87 : vector<2x1x8x4xf32> to vector<2x8x4xf32>
    %89 = vector.shape_cast %86 : vector<2x8x4xf32> to vector<2x1x8x4xf32>
    tpu.vector_store %arg6[%c0_92, %c2_93, %c0_94, %c32_95], %89 {strides = array<i32>} : memref<2x4x8x36xf32, #tpu.memory_space<vmem>>, vector<2x1x8x4xf32>,
    %c0_96 = arith.constant 0 : index
    %c6_97 = arith.constant 6 : index
    %c0_98 = arith.constant 0 : index
    %c0_99 = arith.constant 0 : index
    %90 = vector.load %arg1[%c0_96, %c6_97, %c0_98, %c0_99] : memref<2x8x9x8xf32, #tpu.memory_space<vmem>>, vector<2x1x9x8xf32>
    %91 = vector.shape_cast %90 : vector<2x1x9x8xf32> to vector<2x9x8xf32>
    %92 = vector.extract_strided_slice %91 {offsets = [0, 0, 0], sizes = [2, 8, 8], strides = [1, 1, 1]} : vector<2x9x8xf32> to vector<2x8x8xf32>
    %c0_100 = arith.constant 0 : index
    %c3_101 = arith.constant 3 : index
    %c0_102 = arith.constant 0 : index
    %c0_103 = arith.constant 0 : index
    %93 = vector.load %arg6[%c0_100, %c3_101, %c0_102, %c0_103] : memref<2x4x8x36xf32, #tpu.memory_space<vmem>>, vector<2x1x8x8xf32>
    %94 = vector.shape_cast %93 : vector<2x1x8x8xf32> to vector<2x8x8xf32>
    %95 = vector.shape_cast %92 : vector<2x8x8xf32> to vector<2x1x8x8xf32>
    tpu.vector_store %arg6[%c0_100, %c3_101, %c0_102, %c0_103], %95 {strides = array<i32>} : memref<2x4x8x36xf32, #tpu.memory_space<vmem>>, vector<2x1x8x8xf32>,
    %96 = vector.extract_strided_slice %91 {offsets = [0, 1, 0], sizes = [2, 8, 4], strides = [1, 1, 1]} : vector<2x9x8xf32> to vector<2x8x4xf32>
    %c0_104 = arith.constant 0 : index
    %c3_105 = arith.constant 3 : index
    %c0_106 = arith.constant 0 : index
    %c8_107 = arith.constant 8 : index
    %97 = vector.load %arg6[%c0_104, %c3_105, %c0_106, %c8_107] : memref<2x4x8x36xf32, #tpu.memory_space<vmem>>, vector<2x1x8x4xf32>
    %98 = vector.shape_cast %97 : vector<2x1x8x4xf32> to vector<2x8x4xf32>
    %99 = vector.shape_cast %96 : vector<2x8x4xf32> to vector<2x1x8x4xf32>
    tpu.vector_store %arg6[%c0_104, %c3_105, %c0_106, %c8_107], %99 {strides = array<i32>} : memref<2x4x8x36xf32, #tpu.memory_space<vmem>>, vector<2x1x8x4xf32>,
    %c0_108 = arith.constant 0 : index
    %c7 = arith.constant 7 : index
    %c0_109 = arith.constant 0 : index
    %c0_110 = arith.constant 0 : index
    %100 = vector.load %arg1[%c0_108, %c7, %c0_109, %c0_110] : memref<2x8x9x8xf32, #tpu.memory_space<vmem>>, vector<2x1x9x8xf32>
    %101 = vector.shape_cast %100 : vector<2x1x9x8xf32> to vector<2x9x8xf32>
    %102 = vector.extract_strided_slice %101 {offsets = [0, 0, 0], sizes = [2, 8, 8], strides = [1, 1, 1]} : vector<2x9x8xf32> to vector<2x8x8xf32>
    %c0_111 = arith.constant 0 : index
    %c3_112 = arith.constant 3 : index
    %c0_113 = arith.constant 0 : index
    %c12_114 = arith.constant 12 : index
    %103 = vector.load %arg6[%c0_111, %c3_112, %c0_113, %c12_114] : memref<2x4x8x36xf32, #tpu.memory_space<vmem>>, vector<2x1x8x8xf32>
    %104 = vector.shape_cast %103 : vector<2x1x8x8xf32> to vector<2x8x8xf32>
    %105 = vector.shape_cast %102 : vector<2x8x8xf32> to vector<2x1x8x8xf32>
    tpu.vector_store %arg6[%c0_111, %c3_112, %c0_113, %c12_114], %105 {strides = array<i32>} : memref<2x4x8x36xf32, #tpu.memory_space<vmem>>, vector<2x1x8x8xf32>,
    %106 = vector.extract_strided_slice %101 {offsets = [0, 1, 0], sizes = [2, 8, 4], strides = [1, 1, 1]} : vector<2x9x8xf32> to vector<2x8x4xf32>
    %c0_115 = arith.constant 0 : index
    %c3_116 = arith.constant 3 : index
    %c0_117 = arith.constant 0 : index
    %c20_118 = arith.constant 20 : index
    %107 = vector.load %arg6[%c0_115, %c3_116, %c0_117, %c20_118] : memref<2x4x8x36xf32, #tpu.memory_space<vmem>>, vector<2x1x8x4xf32>
    %108 = vector.shape_cast %107 : vector<2x1x8x4xf32> to vector<2x8x4xf32>
    %109 = vector.shape_cast %106 : vector<2x8x4xf32> to vector<2x1x8x4xf32>
    tpu.vector_store %arg6[%c0_115, %c3_116, %c0_117, %c20_118], %109 {strides = array<i32>} : memref<2x4x8x36xf32, #tpu.memory_space<vmem>>, vector<2x1x8x4xf32>,
    %c0_119 = arith.constant 0 : index
    %c0_120 = arith.constant 0 : index
    %c0_121 = arith.constant 0 : index
    %c0_122 = arith.constant 0 : index
    %110 = vector.load %arg2[%c0_119, %c0_120, %c0_121, %c0_122] : memref<2x1x9x8xf32, #tpu.memory_space<vmem>>, vector<2x1x9x8xf32>
    %111 = vector.shape_cast %110 : vector<2x1x9x8xf32> to vector<2x9x8xf32>
    %112 = vector.extract_strided_slice %111 {offsets = [0, 0, 0], sizes = [2, 8, 8], strides = [1, 1, 1]} : vector<2x9x8xf32> to vector<2x8x8xf32>
    %c0_123 = arith.constant 0 : index
    %c3_124 = arith.constant 3 : index
    %c0_125 = arith.constant 0 : index
    %c24_126 = arith.constant 24 : index
    %113 = vector.load %arg6[%c0_123, %c3_124, %c0_125, %c24_126] : memref<2x4x8x36xf32, #tpu.memory_space<vmem>>, vector<2x1x8x8xf32>
    %114 = vector.shape_cast %113 : vector<2x1x8x8xf32> to vector<2x8x8xf32>
    %115 = vector.shape_cast %112 : vector<2x8x8xf32> to vector<2x1x8x8xf32>
    tpu.vector_store %arg6[%c0_123, %c3_124, %c0_125, %c24_126], %115 {strides = array<i32>} : memref<2x4x8x36xf32, #tpu.memory_space<vmem>>, vector<2x1x8x8xf32>,
    %116 = vector.extract_strided_slice %111 {offsets = [0, 1, 0], sizes = [2, 8, 4], strides = [1, 1, 1]} : vector<2x9x8xf32> to vector<2x8x4xf32>
    %c0_127 = arith.constant 0 : index
    %c3_128 = arith.constant 3 : index
    %c0_129 = arith.constant 0 : index
    %c32_130 = arith.constant 32 : index
    %117 = vector.load %arg6[%c0_127, %c3_128, %c0_129, %c32_130] : memref<2x4x8x36xf32, #tpu.memory_space<vmem>>, vector<2x1x8x4xf32>
    %118 = vector.shape_cast %117 : vector<2x1x8x4xf32> to vector<2x8x4xf32>
    %119 = vector.shape_cast %116 : vector<2x8x4xf32> to vector<2x1x8x4xf32>
    tpu.vector_store %arg6[%c0_127, %c3_128, %c0_129, %c32_130], %119 {strides = array<i32>} : memref<2x4x8x36xf32, #tpu.memory_space<vmem>>, vector<2x1x8x4xf32>,
    %c0_131 = arith.constant 0 : index
    %c0_132 = arith.constant 0 : index
    %c0_133 = arith.constant 0 : index
    %c0_134 = arith.constant 0 : index
    %120 = vector.load %arg6[%c0_131, %c0_132, %c0_133, %c0_134] : memref<2x4x8x36xf32, #tpu.memory_space<vmem>>, vector<2x4x8x36xf32>
    %121 = vector.shape_cast %120 : vector<2x4x8x36xf32> to vector<64x36xf32>
    %c0_135 = arith.constant 0 : index
    %c0_136 = arith.constant 0 : index
    %122 = vector.load %arg3[%c0_135, %c0_136] : memref<36x128xf32, #tpu.memory_space<vmem>>, vector<36x128xf32>
    %cst = arith.constant dense<0.000000e+00> : vector<64x128xf32>
    %123 = tpu.matmul %121, %122, %cst {dimension_numbers = #tpu.dot_dimension_numbers<[1], [0], [0], [1], [0, 0, 1, 1], [], []>} : vector<64x36xf32>, vector<36x128xf32>, vector<64x128xf32> -> vector<64x128xf32>
    %124 = vector.shape_cast %123 : vector<64x128xf32> to vector<2x4x8x128xf32>
    %c0_137 = arith.constant 0 : index
    %c0_138 = arith.constant 0 : index
    %125 = vector.load %arg4[%c0_137, %c0_138] : memref<1x128xf32, #tpu.memory_space<vmem>>, vector<1x128xf32>
    %126 = vector.shape_cast %125 : vector<1x128xf32> to vector<1x1x1x128xf32>
    %127 = vector.broadcast %126 : vector<1x1x1x128xf32> to vector<2x4x8x128xf32>
    %128 = arith.addf %124, %127 : vector<2x4x8x128xf32>
    %c0_139 = arith.constant 0 : index
    %c0_140 = arith.constant 0 : index
    %c0_141 = arith.constant 0 : index
    %c0_142 = arith.constant 0 : index
    %129 = vector.load %arg5[%c0_139, %c0_140, %c0_141, %c0_142] : memref<2x4x8x128xf32, #tpu.memory_space<vmem>>, vector<2x4x8x128xf32>
    tpu.vector_store %arg5[%c0_139, %c0_140, %c0_141, %c0_142], %128 {strides = array<i32>} : memref<2x4x8x128xf32, #tpu.memory_space<vmem>>, vector<2x4x8x128xf32>,
    return
  }
  func.func @transform_0(%arg0: i32) -> (i32, i32, i32, i32) {
    %c0_i32 = arith.constant 0 : i32
    %c0_i32_0 = arith.constant 0 : i32
    %c0_i32_1 = arith.constant 0 : i32
    %c0_i32_2 = arith.constant 0 : i32
    return %c0_i32, %arg0, %c0_i32_0, %c0_i32_1 : i32, i32, i32, i32
  }
  func.func @transform_1(%arg0: i32) -> (i32, i32, i32, i32) {
    %c1_i32 = arith.constant 1 : i32
    %0 = arith.addi %arg0, %c1_i32 : i32
    %c8_i32 = arith.constant 8 : i32
    %1 = arith.muli %c8_i32, %0 : i32
    %c0_i32 = arith.constant 0 : i32
    %c0_i32_0 = arith.constant 0 : i32
    %c0_i32_1 = arith.constant 0 : i32
    %c0_i32_2 = arith.constant 0 : i32
    return %c0_i32, %1, %c0_i32_0, %c0_i32_1 : i32, i32, i32, i32
  }
  func.func @transform_2(%arg0: i32) -> (i32, i32) {
    %c0_i32 = arith.constant 0 : i32
    %c0_i32_0 = arith.constant 0 : i32
    %c0_i32_1 = arith.constant 0 : i32
    return %c0_i32, %c0_i32_0 : i32, i32
  }
  func.func @transform_3(%arg0: i32) -> (i32, i32) {
    %c0_i32 = arith.constant 0 : i32
    %c0_i32_0 = arith.constant 0 : i32
    %c0_i32_1 = arith.constant 0 : i32
    return %c0_i32, %c0_i32_0 : i32, i32
  }
  func.func @transform_4(%arg0: i32) -> (i32, i32, i32, i32) {
    %c0_i32 = arith.constant 0 : i32
    %c0_i32_0 = arith.constant 0 : i32
    %c0_i32_1 = arith.constant 0 : i32
    %c0_i32_2 = arith.constant 0 : i32
    return %c0_i32, %arg0, %c0_i32_0, %c0_i32_1 : i32, i32, i32, i32
  }
}

</mosaic_0001>

<bundles_post_ra>
// kernel: downsample_forward.1
= control target key start
LH: loop header
LB: loop body
LE: loop exit
PB: predicated region body
PF: predicated region fallthrough
CT: control target
= control target key end

     0   :  { %s1551_s15 = smov 0   ;;  %s1553_s16 = smov 0   ;;  %s2040_s0 = inlined_call_operand.vmem [shape: f32[2,17,9,8], index: 0, kind: input, shape index: {}, may-alias: {0,1}]   ;;  %s2041_s1 = inlined_call_operand.vmem [shape: f32[2,17,9,8], index: 1, kind: input, shape index: {}, may-alias: {0,1}]   ;;  %s2042_s2 = inlined_call_operand.vmem [shape: f32[36,128], index: 2, kind: input, shape index: {}]   ;;  %s2043_s3 = inlined_call_operand.vmem [shape: f32[1,128], index: 3, kind: input, shape index: {}]   ;;  %s2044_s4 = inlined_call_operand.vmem [shape: f32[2,8,8,128], index: 4, kind: output, shape index: {}]  }
   0x1   :  { %s1555_s17 = smov 0   ;;  %s1557_s18 = smov 0  }
   0x2   :  { %s1559_s19 = smov 0  }
   0x3 LB: > { %s2045_s20 = sadd.s32 4294967295, %s1487_s19   ;;  %s1578_s21 = sadd.s32 1, %s1487_s19   ;;  %s1487_s19 = sphi %s1559_s19, %s2058_s19   ;;  %s1483_s18 = sphi %s1557_s18, %s2057_s18   ;;  %s1479_s17 = sphi %s1555_s17, %s2056_s17   ;;  %s1475_s16 = sphi %s1553_s16, %s2055_s16   ;;  %s1471_s15 = sphi %s1551_s15, %s2054_s15  }
   0x4   : > { %s18_s22 = ssub.s32 %s1487_s19, %s1578_s21  ;;  %s21_s23 = sadd.s32 1, %s1483_s18 }
   0x5   : > { %p19_p0 = scmp.eq.s32.totalorder %s18_s22, 0  ;;  %p28_p1 = scmp.ne.s32.totalorder %s1483_s18, %s1479_s17 }
   0x6   : > { %p29_p2 = scmp.eq.s32.totalorder %s1487_s19, 0  ;;  %s1280_s24 = sshll.u32 %s1487_s19, 3 }
   0x7   : > { %s1588_s25 = scalar_select %p19_p0, %s1483_s18, %s21_s23  }
   0x8   : > { %p30_p3 = por %p29_p2, %p28_p1  ;;  %s1281_s26 = sadd.s32 8, %s1280_s24 }
   0x9   : > { %s1283_s27 = sadd.s32 8, %s1281_s26  ;;  %s51_s28 = sadd.s32 1, %s1475_s16 }
   0xa   : > { %s48_s29 = ssub.s32 %s1281_s26, %s1283_s27  ;;  %p58_p4 = scmp.ne.s32.totalorder %s1475_s16, %s1471_s15 }
   0xb   : > { %p49_p5 = scmp.eq.s32.totalorder %s48_s29, 0  ;;  %p130_p6 = scmp.eq.s32.totalorder %s2045_s20, 1 }
   0xc   : > { %p1598_p7 = por %p58_p4, %p29_p2  ;;  %p1197_p9 = scmp.ge.s32.totalorder %s1487_s19, 2 }
   0xd   : > { %s1603_s5 = scalar_select %p49_p5, %s1475_s16, %s51_s28  }
   0xe   : > { %p1608_p8 = por %p130_p6, %p28_p1  ;;  %158 = sbr.rel (%p1197_p9) target bundleno = 96 (0x60), region = 24 }
  0x13   : > { %161 = sbr.rel (!%p30_p3) target bundleno = 88 (0x58), region = 28  ;;  %s163_s7 = sand.u32 (%p30_p3), 1, %s1483_s18  }
  0x14   : > { %s167_s8 = ssub.s32 (%p30_p3), 17, %s1280_s24  ;;  %s1198_s9 = sshll.u32 (%p30_p3), %s163_s7, 8 }
  0x15   : > { %p168_p10 = scmp.lt.s32.totalorder (%p30_p3), %s167_s8, 8  ;;  %s1286_s10 = sshll.u32 (%p30_p3), %s1487_s19, 7 }
  0x16   : > { %s1620_s13 = scalar_lea.vmem (%p30_p3), %s2040_s0, %s1286_s10   ;;  %s1624_s23 = scalar_lea.vmem (%p30_p3), [#allocation3], %s1198_s9  }
  0x18   : > { %s2060_s8 = smov (!%p168_p10, %s167_s8), 8 }
  0x19   : > { %s1284_s14 = sshll.u32 %s2060_s8, 5  ;;  %s1205_s22 = sshll.u32 %s2060_s8, 1 }
  0x1a   : > { %p1206_p11 = scmp.eq.s32.totalorder %s1284_s14, 0 }
  0x1b   : > { %s1628_s24 = sshrl.u32 (!%p1206_p11), %s1205_s22, 4 }
  0x1c   : > { %179 = sbr.rel (%p1206_p11) target bundleno = 88 (0x58), region = 32  ;;  %p1207_p12 = scmp.le.s32.totalorder (!%p1206_p11), %s1628_s24, 0 }
  0x21   : > { %1143 = sbr.rel (%p1207_p12) target bundleno = 71 (0x47), region = 219  ;;  %s2048_s26 = smov (!%p1207_p12), %s1624_s23 }
  0x22   : > { %s2049_s27 = smov (!%p1207_p12), %s1620_s13  ;;  %s1637_s28 = smov (!%p1207_p12), 0  }
  0x23   : > { %s1639_s29 = smov (!%p1207_p12), 0  }
  0x26 LB: >> { %v306_v0 = vld [vmem:[%s1495_s27] sm:$0xff]  ;;  %v308_v1 = vld [vmem:[%s1495_s27 + $0x8] sm:$0xff]  ;;  %v310_v2 = vld [vmem:[%s1495_s27 + $0x10] sm:$0xff]  ;;  %s370_s7 = sadd.s32 1, %s1499_s28  ;;  %s300_s29 = sadd.s32 1, %s1503_s29   ;;  %s1503_s29 = sphi %s1639_s29, %s300_s29   ;;  %s1499_s28 = sphi %s1637_s28, %s2052_s28   ;;  %s1495_s27 = sphi %s2049_s27, %s2051_s27   ;;  %s1491_s26 = sphi %s2048_s26, %s2050_s26  }
  0x27   : >> { %307 = vst [vmem:[%s1491_s26] sm:$0xff] %v306_v0  ;;  %v312_v3 = vld [vmem:[%s1495_s27 + $0x18] sm:$0xff]  ;;  %p371_p13 = scmp.ge.s32.totalorder %s370_s7, %s1628_s24  ;;  %v314_v4 = vld [vmem:[%s1495_s27 + $0x20] sm:$0xff]  ;;  %v316_v5 = vld [vmem:[%s1495_s27 + $0x28] sm:$0xff]  ;;  %p299_p0 = scmp.ge.s32.totalorder %s300_s29, %s1628_s24 }
  0x28   : >> { %309 = vst [vmem:[%s1491_s26 + $0x8] sm:$0xff] %v308_v1  ;;  %v318_v6 = vld [vmem:[%s1495_s27 + $0x30] sm:$0xff]  ;;  %v320_v7 = vld [vmem:[%s1495_s27 + $0x38] sm:$0xff]  ;;  %v322_v8 = vld [vmem:[%s1495_s27 + $0x40] sm:$0xff] }
  0x29   : >> { %311 = vst [vmem:[%s1491_s26 + $0x10] sm:$0xff] %v310_v2  ;;  %s2062_s7 = smov (%p371_p13, %s370_s7), 0  ;;  %v324_v9 = vld [vmem:[%s1495_s27 + $0x48] sm:$0xff]  ;;  %v326_v10 = vld [vmem:[%s1495_s27 + $0x50] sm:$0xff]  ;;  %v328_v11 = vld [vmem:[%s1495_s27 + $0x58] sm:$0xff] }
  0x2a   : >> { %313 = vst [vmem:[%s1491_s26 + $0x18] sm:$0xff] %v312_v3  ;;  %s1208_s9 = sshll.u32 %s2062_s7, 7  ;;  %v330_v12 = vld [vmem:[%s1495_s27 + $0x60] sm:$0xff]  ;;  %v332_v13 = vld [vmem:[%s1495_s27 + $0x68] sm:$0xff]  ;;  %v334_v14 = vld [vmem:[%s1495_s27 + $0x70] sm:$0xff]  ;;  %s2052_s28 = smov %s2062_s7 }
  0x2b   : >> { %315 = vst [vmem:[%s1491_s26 + $0x20] sm:$0xff] %v314_v4  ;;  %s1671_s10 = scalar_lea.vmem %s1620_s13, %s1208_s9   ;;  %s1674_s11 = scalar_lea.vmem %s1624_s23, %s1208_s9 [#allocation3]   ;;  %v336_v15 = vld [vmem:[%s1495_s27 + $0x78] sm:$0xff]  ;;  %v338_v16 = vld [vmem:[%s1495_s27 + $0x110] sm:$0xff]  ;;  %v342_v18 = vld [vmem:[%s1495_s27 + $0x120] sm:$0xff] }
  0x2c   : >> { %317 = vst [vmem:[%s1491_s26 + $0x28] sm:$0xff] %v316_v5  ;;  %v340_v17 = vld [vmem:[%s1495_s27 + $0x118] sm:$0xff]  ;;  %v344_v19 = vld [vmem:[%s1495_s27 + $0x128] sm:$0xff]  ;;  %v346_v20 = vld [vmem:[%s1495_s27 + $0x130] sm:$0xff] }
  0x2d   : >> { %319 = vst [vmem:[%s1491_s26 + $0x30] sm:$0xff] %v318_v6  ;;  %v348_v21 = vld [vmem:[%s1495_s27 + $0x138] sm:$0xff]  ;;  %v350_v22 = vld [vmem:[%s1495_s27 + $0x140] sm:$0xff]  ;;  %v352_v23 = vld [vmem:[%s1495_s27 + $0x148] sm:$0xff] }
  0x2e   : >> { %321 = vst [vmem:[%s1491_s26 + $0x38] sm:$0xff] %v320_v7  ;;  %v354_v24 = vld [vmem:[%s1495_s27 + $0x150] sm:$0xff]  ;;  %v356_v25 = vld [vmem:[%s1495_s27 + $0x158] sm:$0xff]  ;;  %v358_v26 = vld [vmem:[%s1495_s27 + $0x160] sm:$0xff] }
  0x2f   : >> { %323 = vst [vmem:[%s1491_s26 + $0x40] sm:$0xff] %v322_v8  ;;  %v360_v27 = vld [vmem:[%s1495_s27 + $0x168] sm:$0xff]  ;;  %v362_v28 = vld [vmem:[%s1495_s27 + $0x170] sm:$0xff]  ;;  %v364_v29 = vld [vmem:[%s1495_s27 + $0x178] sm:$0xff] }
  0x30   : >> { %325 = vst [vmem:[%s1491_s26 + $0x48] sm:$0xff] %v324_v9  ;;  %v366_v30 = vld [vmem:[%s1495_s27 + $0x180] sm:$0xff]  ;;  %v368_v31 = vld [vmem:[%s1495_s27 + $0x188] sm:$0xff]  ;;  %s2051_s27 = smov %s1671_s10 }
  0x31   : >> { %327 = vst [vmem:[%s1491_s26 + $0x50] sm:$0xff] %v326_v10 }
  0x32   : >> { %329 = vst [vmem:[%s1491_s26 + $0x58] sm:$0xff] %v328_v11 }
  0x33   : >> { %331 = vst [vmem:[%s1491_s26 + $0x60] sm:$0xff] %v330_v12 }
  0x34   : >> { %333 = vst [vmem:[%s1491_s26 + $0x68] sm:$0xff] %v332_v13 }
  0x35   : >> { %335 = vst [vmem:[%s1491_s26 + $0x70] sm:$0xff] %v334_v14 }
  0x36   : >> { %337 = vst [vmem:[%s1491_s26 + $0x78] sm:$0xff] %v336_v15 }
  0x37   : >> { %339 = vst [vmem:[%s1491_s26 + $0x80] sm:$0xff] %v338_v16 }
  0x38   : >> { %341 = vst [vmem:[%s1491_s26 + $0x88] sm:$0xff] %v340_v17 }
  0x39   : >> { %343 = vst [vmem:[%s1491_s26 + $0x90] sm:$0xff] %v342_v18 }
  0x3a   : >> { %345 = vst [vmem:[%s1491_s26 + $0x98] sm:$0xff] %v344_v19 }
  0x3b   : >> { %347 = vst [vmem:[%s1491_s26 + $0xa0] sm:$0xff] %v346_v20 }
  0x3c   : >> { %349 = vst [vmem:[%s1491_s26 + $0xa8] sm:$0xff] %v348_v21 }
  0x3d   : >> { %351 = vst [vmem:[%s1491_s26 + $0xb0] sm:$0xff] %v350_v22 }
  0x3e   : >> { %353 = vst [vmem:[%s1491_s26 + $0xb8] sm:$0xff] %v352_v23 }
  0x3f   : >> { %355 = vst [vmem:[%s1491_s26 + $0xc0] sm:$0xff] %v354_v24 }
  0x40   : >> { %357 = vst [vmem:[%s1491_s26 + $0xc8] sm:$0xff] %v356_v25 }
  0x41   : >> { %359 = vst [vmem:[%s1491_s26 + $0xd0] sm:$0xff] %v358_v26 }
  0x42   : >> { %361 = vst [vmem:[%s1491_s26 + $0xd8] sm:$0xff] %v360_v27  ;;  %302 = sbr.rel (!%p299_p0) target bundleno = 38 (0x26), region = 225 }
  0x43   : >> { %363 = vst [vmem:[%s1491_s26 + $0xe0] sm:$0xff] %v362_v28 }
  0x44   : >> { %365 = vst [vmem:[%s1491_s26 + $0xe8] sm:$0xff] %v364_v29 }
  0x45   : >> { %367 = vst [vmem:[%s1491_s26 + $0xf0] sm:$0xff] %v366_v30 }
  0x46   : >> { %369 = vst [vmem:[%s1491_s26 + $0xf8] sm:$0xff] %v368_v31  ;;  %s2050_s26 = smov %s1674_s11 }
  0x47 PF: > { %s1740_s12 = sand.u32 15, %s1205_s22   ;;  %s1287_s14 = sshll.u32 %s1628_s24, 7 }
  0x48   : > { %s1744_s9 = scalar_lea.vmem %s1620_s13, %s1287_s14   ;;  %s383_s20 = scalar_lea.vmem %s1624_s23, %s1287_s14 [#allocation3]  }
  0x49   : > { %p1213_p1 = scmp.le.s32.totalorder %s1740_s12, 0 }
  0x4a   : > { %s1505_s10 = smov (!%p1213_p1), %s383_s20   ;;  %s1509_s7 = smov (!%p1213_p1), %s1744_s9  }
  0x4b   : > { %1157 = sbr.rel (%p1213_p1) target bundleno = 88 (0x58), region = 230  ;;  %s1513_s29 = smov (!%p1213_p1), 0  }
  0x4c   : > { %s1517_s11 = smov (!%p1213_p1), 0  }
  0x50 LB: >> { %v393_v32 = vld [vmem:[%s1511_s7] sm:$0xff]  ;;  %v395_v33 = vld [vmem:[%s1511_s7 + $0x110] sm:$0xff]  ;;  %s397_s8 = sadd.s32 1, %s1515_s29  ;;  %s387_s11 = sadd.s32 1, %s1519_s11   ;;  %s1519_s11 = sphi %s1517_s11, %s387_s11   ;;  %s1515_s29 = sphi %s1513_s29, %s1514_s29   ;;  %s1511_s7 = sphi %s1509_s7, %s402_s7   ;;  %s1507_s10 = sphi %s1505_s10, %s403_s10  }
  0x51   : >> { %394 = vst [vmem:[%s1507_s10] sm:$0xff] %v393_v32  ;;  %p398_p2 = scmp.ge.s32.totalorder %s397_s8, %s1740_s12  ;;  %p386_p3 = scmp.ge.s32.totalorder %s387_s11, %s1740_s12 }
  0x52   : >> { %396 = vst [vmem:[%s1507_s10 + $0x80] sm:$0xff] %v395_v33 }
  0x53   : >> { %s2064_s8 = smov (%p398_p2, %s397_s8), 0  ;;  %389 = sbr.rel (!%p386_p3) target bundleno = 80 (0x50), region = 236 }
  0x54   : >> { %s1214_s13 = sshll.u32 %s2064_s8, 3  ;;  %s1514_s29 = smov %s2064_s8  }
  0x55   : >> { %s402_s7 = scalar_lea.vmem %s1744_s9, %s1214_s13   ;;  %s403_s10 = scalar_lea.vmem %s383_s20, %s1214_s13 [#allocation3]  }
  0x58 PF: > { %409 = sbr.rel (!%p1598_p7) target bundleno = 96 (0x60), region = 80  ;;  %s411_s22 = sand.u32 (%p1598_p7), 1, %s1475_s16  }
  0x59   : > { %s1217_s23 = sshll.u32 (%p1598_p7), %s1487_s19, 7  ;;  %s1216_s24 = sshll.u32 (%p1598_p7), %s411_s22, 5 }
  0x5a   : > { %s1112_s28 = scalar_lea.vmem (%p1598_p7), %s2041_s1, %s1217_s23  ;;  %s413_s14 = scalar_lea.vmem (%p1598_p7), [#allocation4], %s1216_s24 }
  0x5b   : > { %v1218_v34 = vld [vmem:[%s1112_s28 + $0x80] sm:$0xff] (%p1598_p7)  ;;  %v1219_v35 = vld [vmem:[%s1112_s28 + $0x88] sm:$0xff] (%p1598_p7)  ;;  %v1220_v36 = vld [vmem:[%s1112_s28 + $0x190] sm:$0xff] (%p1598_p7) }
  0x5c   : > { %454 = vst [vmem:[%s413_s14] sm:$0xff] (%p1598_p7), %v1218_v34  ;;  %v1221_v37 = vld [vmem:[%s1112_s28 + $0x198] sm:$0xff] (%p1598_p7) }
  0x5d   : > { %456 = vst [vmem:[%s413_s14 + $0x8] sm:$0xff] %v1219_v35 }
  0x5e   : > { %458 = vst [vmem:[%s413_s14 + $0x10] sm:$0xff] %v1220_v36 }
  0x5f   : > { %460 = vst [vmem:[%s413_s14 + $0x18] sm:$0xff] %v1221_v37 }
  0x60 PF: > { %p1222_p4 = scmp.ge.s32.totalorder %s1487_s19, 1  ;;  %p465_p5 = scmp.lt.s32.totalorder %s1487_s19, 3 }
  0x62   : > { %p466_p6 = pnand %p1222_p4, %p465_p5 }
  0x63   : > { %s472_s20 = sand.u32 (!%p466_p6), 1, %s1479_s17   ;;  %s1521_s9 = smov (!%p466_p6), 8  }
  0x64   : > { %469 = sbr.rel (%p466_p6) target bundleno = 535 (0x217), region = 118  ;;  %s1223_s30 = sshll.u32 (!%p466_p6), %s472_s20, 8 }
  0x65   : > { %s1764_s12 = scalar_lea.vmem (!%p466_p6), [#allocation3], %s1223_s30  ;;  %s1522_s10 = smov (!%p466_p6), 12  }
  0x66   : > { %s1523_s7 = smov (!%p466_p6), 20   ;;  %s1524_s29 = smov (!%p466_p6), 24  }
  0x67   : > { %s1525_s11 = smov (!%p466_p6), 32   ;;  %s479_s8 = sand.u32 (!%p466_p6), 1, %s1471_s15  }
  0x68   : > { %s1224_s13 = sshll.u32 (!%p466_p6), %s479_s8, 5 }
  0x69   : > { %vm520_vm0 = vcmask 64512   ;;  %v1767_v38 = vld [vmem:[%s1764_s12 + $0xc0] sm:$0xff]  ;;  %v1228_v40 = vld [vmem:[%s1764_s12 + $0x90] sm:$0xff]  ;;  %v1249_v42 = vld [vmem:[%s1764_s12 + $0xc8] sm:$0x1]  ;;  %s1865_s22 = scalar_lea.vmem [#allocation4], %s1224_s13 }
  0x6a   : > { %v518_v39 = vld [vmem:[%s1764_s12 + $0x80] sm:$0xff]  ;;  %725 = vrot.lane.b32.xlu1 %v1767_v38, %s1521_s9  ;;  %716 = vst.msk [vmem:[#allocation2 + $0x30] sm:$0xff] %vm520_vm0, %v1767_v38  ;;  %554 = vrot.lane.b32.xlu2 %v1228_v40, %s1522_s10  ;;  %v519_v43 = vld [vmem:[%s1764_s12 + $0x88] sm:$0x1]  ;;  %vm933_vm1 = vcmask 1043456   ;;  %vm539_vm2 = vcmask 97345  }
  0x6b   : > { %531 = vrot.lane.b32.xlu0 %v518_v39, %s1521_s9  ;;  %522 = vst.msk [vmem:[#allocation2 + $0x20] sm:$0xff] %vm520_vm0, %v518_v39  ;;  %v1232_v41 = vld [vmem:[%s1764_s12 + $0xa0] sm:$0xff]  ;;  %v1252_v44 = vld [vmem:[%s1764_s12 + $0xd0] sm:$0xff]  ;;  %v1229_v47 = vld [vmem:[%s1764_s12 + $0x98] sm:$0x1]  ;;  %vm541_vm3 = vcmask 90176  }
  0x6c   : > { %623 = vst.msk [vmem:[#allocation2 + $0x28] sm:$0xff] %vm520_vm0, %v1232_v41  ;;  %v516_v45 = vld [vmem:[%s1764_s12] sm:$0xff]  ;;  %v1253_v49 = vld [vmem:[%s1764_s12 + $0xd8] sm:$0x1]  ;;  %v1233_v50 = vld [vmem:[%s1764_s12 + $0xa8] sm:$0x1] }
  0x6d   : > { %521 = vst.msk [vmem:[#allocation2] sm:$0xff] %vm520_vm0, %v516_v45  ;;  %v1788_v46 = vld [vmem:[%s1764_s12 + $0x40] sm:$0xff]  ;;  %v1257_v51 = vld [vmem:[%s1764_s12 + $0xe8] sm:$0x1]  ;;  %v1226_v55 = vld [vmem:[%s1764_s12 + $0x10] sm:$0xff]  ;;  %vm558_vm4 = vcmask 162912  }
  0x6e   : > { %715 = vst.msk [vmem:[#allocation2 + $0x10] sm:$0xff] %vm520_vm0, %v1788_v46  ;;  %v1256_v48 = vld [vmem:[%s1764_s12 + $0xe0] sm:$0xff]  ;;  %v517_v52 = vld [vmem:[%s1764_s12 + $0x8] sm:$0x1]  ;;  %v1250_v56 = vld [vmem:[%s1764_s12 + $0x50] sm:$0xff]  ;;  %vm575_vm5 = vcmask 195745  }
  0x6f   : > { %809 = vst.msk [vmem:[#allocation2 + $0x38] sm:$0xff] %vm520_vm0, %v1256_v48  ;;  %v1812_v53 = vld [vmem:[%s1764_s12 + $0x20] sm:$0xff]  ;;  %v1247_v54 = vld [vmem:[%s1764_s12 + $0x48] sm:$0x1]  ;;  %v1227_v57 = vld [vmem:[%s1764_s12 + $0x18] sm:$0x1] }
  0x70   : > { %622 = vst.msk [vmem:[#allocation2 + $0x8] sm:$0xff] %vm520_vm0, %v1812_v53  ;;  %v1237_v58 = vld [vmem:[%s1764_s12 + $0xa8] sm:$0x1]  ;;  %v1251_v59 = vld [vmem:[%s1764_s12 + $0x58] sm:$0x1]  ;;  %v1240_v61 = vld [vmem:[%s1764_s12 + $0xb0] sm:$0xff] }
  0x71   : > { %v1261_v60 = vld [vmem:[%s1764_s12 + $0xe8] sm:$0x1]  ;;  %v1839_v62 = vld [vmem:[%s1764_s12 + $0x60] sm:$0xff]  ;;  %v1264_v63 = vld [vmem:[%s1764_s12 + $0xf0] sm:$0xff]  ;;  %vm577_vm6 = vcmask 188576   ;;  %vm594_vm7 = vcmask 261312  }
  0x72   : > { %727 = vrot.lane.b32.xlu1 %v1249_v42, %s1521_s9  ;;  %746 = vrot.lane.b32.xlu2 %v1252_v44, %s1522_s10  ;;  %808 = vst.msk [vmem:[#allocation2 + $0x18] sm:$0xff] %vm520_vm0, %v1839_v62  ;;  %v1231_v0 = vld [vmem:[%s1764_s12 + $0x28] sm:$0x1]  ;;  %v1241_v2 = vld [vmem:[%s1764_s12 + $0xb8] sm:$0x1]  ;;  %vm611_vm8 = vcmask 294145  }
  0x73   : > { %533 = vrot.lane.b32.xlu0 %v519_v43, %s1521_s9  ;;  %v1255_v4 = vld [vmem:[%s1764_s12 + $0x68] sm:$0x1]  ;;  %v1265_v5 = vld [vmem:[%s1764_s12 + $0xf8] sm:$0x1]  ;;  %v865_v7 = vld [vmem:[%s1865_s22 + $0x10] sm:$0xff]  ;;  %vm613_vm9 = vcmask 286976  }
  0x74   : > { %v907_v8 = vld [vmem:[%s2042_s2 + $0x20] sm:$0xf]  ;;  %v906_v12 = vld [vmem:[%s2042_s2 + $0x18] sm:$0xff]  ;;  %v905_v13 = vld [vmem:[%s2042_s2 + $0x10] sm:$0xff]  ;;  %vm908_vm10 = vcmask 293888   ;;  %s2053_s17 = sadd.s32 (%p1608_p8), 4294967295, %s1487_s19  }
  0x75   : > { %1293 = vmatpush.msk.msra.mxu2 %vm933_vm1, %v907_v8  ;;  %1294 = vmatpush.msk.msra.mxu3 %vm933_vm1, %v907_v8  ;;  %v1245_v14 = vld [vmem:[%s1764_s12 + $0xc8] sm:$0x1]  ;;  %v866_v16 = vld [vmem:[%s1865_s22 + $0x18] sm:$0x1]  ;;  %v903_v17 = vld [vmem:[%s2042_s2] sm:$0xff] }
  0x76   : > { %1266 = vmatpush.msk.msra.mxu0 %vm933_vm1, %v907_v8  ;;  %1292 = vmatpush.msk.msra.mxu1 %vm933_vm1, %v907_v8  ;;  %v904_v15 = vld [vmem:[%s2042_s2 + $0x8] sm:$0xff]  ;;  %v1238_v26 = vld [vmem:[%s1764_s12 + $0x30] sm:$0xff]  ;;  %v1239_v31 = vld [vmem:[%s1764_s12 + $0x38] sm:$0x1] }
  0x77   : > { %1296 = vmatpush.msra.mxu2 %v906_v12  ;;  %1297 = vmatpush.msra.mxu3 %v906_v12  ;;  %v1235_v21 = vld [vmem:[%s1764_s12 + $0x28] sm:$0x1]  ;;  %v1262_v27 = vld [vmem:[%s1764_s12 + $0x70] sm:$0xff]  ;;  %v1263_v35 = vld [vmem:[%s1764_s12 + $0x78] sm:$0x1] }
  0x78   : > { %949 = vmatpush.msra.mxu0 %v906_v12  ;;  %1295 = vmatpush.msra.mxu1 %v906_v12  ;;  %v1259_v25 = vld [vmem:[%s1764_s12 + $0x68] sm:$0x1]  ;;  %v863_v36 = vld [vmem:[%s1865_s22] sm:$0xff] }
  0x79   : > { %1299 = vmatpush.msra.mxu2 %v905_v13  ;;  %1300 = vmatpush.msra.mxu3 %v905_v13 }
  0x7a   : > { %569 = vrot.lane.b32.xlu1 %v1229_v47, %s1523_s7  ;;  %758 = vrot.lane.b32.xlu2 %v1252_v44, %s1523_s7  ;;  %v864_v47 = vld [vmem:[%s1865_s22 + $0x8] sm:$0x1] }
  0x7b   : > { %567 = vrot.lane.b32.xlu0 %v1228_v40, %s1523_s7  ;;  %1302 = vmatpush.msra.mxu2 %v904_v15 }
  0x7c   : > { %1303 = vmatpush.msra.mxu3 %v904_v15  ;;  %950 = vmatpush.msra.mxu0 %v905_v13 }
  0x7d   : > { %1305 = vmatpush.msra.mxu2 %v903_v17  ;;  %1298 = vmatpush.msra.mxu1 %v905_v13 }
  0x7e   : > { %1306 = vmatpush.msra.mxu3 %v903_v17  ;;  %951 = vmatpush.msra.mxu0 %v904_v15 }
  0x7f   : > { %1301 = vmatpush.msra.mxu1 %v904_v15 }
  0x80   : > { %952 = vmatpush.msra.mxu0 %v903_v17 }
  0x81   : > { %1304 = vmatpush.msra.mxu1 %v903_v17 }
  0x82   : > { %590 = vrot.lane.b32.xlu1 %v1232_v41, %s1524_s29  ;;  %779 = vrot.lane.b32.xlu2 %v1256_v48, %s1524_s29 }
  0x83   : > { %760 = vrot.lane.b32.xlu0 %v1253_v49, %s1523_s7 }
  0x8a   : > { %605 = vrot.lane.b32.xlu1 %v1233_v50, %s1525_s11  ;;  %791 = vrot.lane.b32.xlu2 %v1256_v48, %s1525_s11 }
  0x8b   : > { %603 = vrot.lane.b32.xlu0 %v1232_v41, %s1525_s11 }
  0x92   : > { %527 = vrot.lane.b32.xlu1 %v516_v45, %s1521_s9  ;;  %529 = vrot.lane.b32.xlu2 %v517_v52, %s1521_s9 }
  0x93   : > { %793 = vrot.lane.b32.xlu0 %v1257_v51, %s1525_s11 }
  0x9a   : > { %723 = vrot.lane.b32.xlu1 %v1247_v54, %s1521_s9  ;;  %552 = vrot.lane.b32.xlu2 %v1226_v55, %s1522_s10 }
  0x9b   : > { %721 = vrot.lane.b32.xlu0 %v1788_v46, %s1521_s9 }
  0xa2   : > { %563 = vrot.lane.b32.xlu1 %v1226_v55, %s1523_s7  ;;  %565 = vrot.lane.b32.xlu2 %v1227_v57, %s1523_s7 }
  0xa3   : > { %744 = vrot.lane.b32.xlu0 %v1250_v56, %s1522_s10 }
  0xaa   : > { %634 = vrot.lane.b32.xlu1 %v1237_v58, %s1521_s9  ;;  %754 = vrot.lane.b32.xlu2 %v1250_v56, %s1523_s7 }
  0xab   : > { %632 = vrot.lane.b32.xlu0 %v1232_v41, %s1521_s9  ;;  %v1243_v41 = vld [vmem:[%s1764_s12 + $0x48] sm:$0x1]  ;;  %s1225_s12 = sshll.u32 %s472_s20, 6  ;;  %s1289_s20 = sshll.u32 (%p1608_p8), %s2053_s17, 5 }
  0xac   : > { %s1007_s22 = scalar_lea.vmem (%p1608_p8), %s2044_s4, %s1289_s20 }
  0xb2   : > { %818 = vrot.lane.b32.xlu1 %v1256_v48, %s1521_s9  ;;  %820 = vrot.lane.b32.xlu2 %v1261_v60, %s1521_s9 }
  0xb3   : > { %756 = vrot.lane.b32.xlu0 %v1251_v59, %s1523_s7 }
  0xba   : > { %653 = vrot.lane.b32.xlu1 %v1240_v61, %s1522_s10  ;;  %777 = vrot.lane.b32.xlu2 %v1839_v62, %s1524_s29 }
  0xbb   : > { %588 = vrot.lane.b32.xlu0 %v1812_v53, %s1524_s29 }
  0xc2   : > { %599 = vrot.lane.b32.xlu1 %v1812_v53, %s1525_s11  ;;  %601 = vrot.lane.b32.xlu2 %v1231_v0, %s1525_s11 }
  0xc3   : > { %839 = vrot.lane.b32.xlu0 %v1264_v63, %s1522_s10 }
  0xc4   : > { %v555_v1 = vpop.permute.xlu2 %554 }
  0xca   : > { %667 = vrot.lane.b32.xlu1 %v1241_v2, %s1523_s7  ;;  %787 = vrot.lane.b32.xlu2 %v1839_v62, %s1525_s11 }
  0xcb   : > { %665 = vrot.lane.b32.xlu0 %v1240_v61, %s1523_s7 }
  0xcc   : > { %v747_v3 = vpop.permute.xlu2 %746 }
  0xd2   : > { %851 = vrot.lane.b32.xlu1 %v1264_v63, %s1523_s7  ;;  %853 = vrot.lane.b32.xlu2 %v1265_v5, %s1523_s7 }
  0xd3   : > { %789 = vrot.lane.b32.xlu0 %v1255_v4, %s1525_s11 }
  0xd4   : > { %v759_v6 = vpop.permute.xlu2 %758 }
  0xda   : > { %871 = vrot.lane.b32.xlu1 %v865_v7, %s1524_s29  ;;  %698 = vrot.lane.b32.xlu2 %v1767_v38, %s1525_s11 }
  0xdb   : > { %686 = vrot.lane.b32.xlu0 %v1767_v38, %s1524_s29 }
  0xdc   : > { %v726_v9 = vpop.permute.xlu1 %725  ;;  %v780_v11 = vpop.permute.xlu2 %779 }
  0xdd   : > { %v532_v10 = vpop.permute.xlu0 %531  ;;  %735 = vst.msk [vmem:[#allocation2 + $0x2f] sm:$0xfe] %vm539_vm2, %v726_v9 }
  0xde   : > { %543 = vst.msk [vmem:[#allocation2 + $0x1f] sm:$0xfe] %vm539_vm2, %v532_v10 }
  0xe2   : > { %883 = vrot.lane.b32.xlu1 %v865_v7, %s1525_s11  ;;  %885 = vrot.lane.b32.xlu2 %v866_v16, %s1525_s11 }
  0xe3   : > { %700 = vrot.lane.b32.xlu0 %v1245_v14, %s1525_s11 }
  0xe4   : > { %v728_v18 = vpop.permute.xlu1 %727  ;;  %v792_v20 = vpop.permute.xlu2 %791 }
  0xe5   : > { %v534_v19 = vpop.permute.xlu0 %533  ;;  %736 = vst.msk [vmem:[#allocation2 + $0x37] sm:$0x1] %vm541_vm3, %v728_v18 }
  0xe6   : > { %544 = vst.msk [vmem:[#allocation2 + $0x27] sm:$0x1] %vm541_vm3, %v534_v19 }
  0xe7   : > { %560 = vst.msk [vmem:[#allocation2 + $0x20] sm:$0xff] %vm558_vm4, %v555_v1 }
  0xe8   : > { %751 = vst.msk [vmem:[#allocation2 + $0x30] sm:$0xff] %vm558_vm4, %v747_v3 }
  0xe9   : > { %768 = vst.msk [vmem:[#allocation2 + $0x2f] sm:$0xfe] %vm575_vm5, %v759_v6 }
  0xea   : > { %630 = vrot.lane.b32.xlu1 %v1235_v21, %s1521_s9  ;;  %814 = vrot.lane.b32.xlu2 %v1839_v62, %s1521_s9 }
  0xeb   : > { %628 = vrot.lane.b32.xlu0 %v1812_v53, %s1521_s9 }
  0xec   : > { %v570_v22 = vpop.permute.xlu1 %569  ;;  %v530_v24 = vpop.permute.xlu2 %529 }
  0xed   : > { %v568_v23 = vpop.permute.xlu0 %567  ;;  %580 = vst.msk [vmem:[#allocation2 + $0x27] sm:$0x1] %vm577_vm6, %v570_v22 }
  0xee   : > { %579 = vst.msk [vmem:[#allocation2 + $0x1f] sm:$0xfe] %vm575_vm5, %v568_v23 }
  0xef   : > { %542 = vst.msk [vmem:[#allocation2 + $0x7] sm:$0x1] %vm541_vm3, %v530_v24 }
  0xf2   : > { %651 = vrot.lane.b32.xlu1 %v1238_v26, %s1522_s10  ;;  %837 = vrot.lane.b32.xlu2 %v1262_v27, %s1522_s10 }
  0xf3   : > { %816 = vrot.lane.b32.xlu0 %v1259_v25, %s1521_s9 }
  0xf4   : > { %v591_v28 = vpop.permute.xlu1 %590  ;;  %v553_v30 = vpop.permute.xlu2 %552 }
  0xf5   : > { %v761_v29 = vpop.permute.xlu0 %760  ;;  %596 = vst.msk [vmem:[#allocation2 + $0x20] sm:$0xff] %vm594_vm7, %v591_v28  ;;  %v1416_v28 = vld [vmem:[%s2043_s3] ss:$0 sm:$0xff] }
  0xf6   : > { %769 = vst.msk [vmem:[#allocation2 + $0x37] sm:$0x1] %vm577_vm6, %v761_v29 }
  0xf7   : > { %784 = vst.msk [vmem:[#allocation2 + $0x30] sm:$0xff] %vm594_vm7, %v780_v11 }
  0xf8   : > { %801 = vst.msk [vmem:[#allocation2 + $0x2f] sm:$0xfe] %vm611_vm8, %v792_v20 }
  0xfa   : > { %663 = vrot.lane.b32.xlu1 %v1239_v31, %s1523_s7  ;;  %847 = vrot.lane.b32.xlu2 %v1262_v27, %s1523_s7 }
  0xfb   : > { %661 = vrot.lane.b32.xlu0 %v1238_v26, %s1523_s7 }
  0xfc   : > { %v606_v32 = vpop.permute.xlu1 %605  ;;  %v566_v34 = vpop.permute.xlu2 %565 }
  0xfd   : > { %v604_v33 = vpop.permute.xlu0 %603  ;;  %616 = vst.msk [vmem:[#allocation2 + $0x27] sm:$0x1] %vm613_vm9, %v606_v32 }
  0xfe   : > { %615 = vst.msk [vmem:[#allocation2 + $0x1f] sm:$0xfe] %vm611_vm8, %v604_v33 }
 0x102   : > { %684 = vrot.lane.b32.xlu1 %v1788_v46, %s1524_s29  ;;  %869 = vrot.lane.b32.xlu2 %v863_v36, %s1524_s29 }
 0x103   : > { %849 = vrot.lane.b32.xlu0 %v1263_v35, %s1523_s7  ;;  %s1998_s7 = scalar_lea.vmem [#allocation5], %s1225_s12 }
 0x104   : > { %v528_v38 = vpop.permute.xlu1 %527  ;;  %v755_v40 = vpop.permute.xlu2 %754 }
 0x105   : > { %v794_v37 = vpop.permute.xlu0 %793  ;;  %v899_v39 = vld [vmem:[#allocation2 + $0x20] sm:$0xff]  ;;  %540 = vst.msk [vmem:[#allocation2 - $0x1] sm:$0xfe] %vm539_vm2, %v528_v38 }
 0x106   : > { %802 = vst.msk [vmem:[#allocation2 + $0x37] sm:$0x1] %vm613_vm9, %v794_v37  ;;  %1271 = vmatmul.msk.f32.vlgmr.msra.gmra.mxu2 %vm908_vm10, %v899_v39 }
 0x107   : > { %559 = vst.msk [vmem:[#allocation2] sm:$0xff] %vm558_vm4, %v553_v30 }
 0x108   : > { %578 = vst.msk [vmem:[#allocation2 + $0x7] sm:$0x1] %vm577_vm6, %v566_v34 }
 0x10a   : > { %696 = vrot.lane.b32.xlu1 %v1243_v41, %s1525_s11  ;;  %879 = vrot.lane.b32.xlu2 %v863_v36, %s1525_s11 }
 0x10b   : > { %694 = vrot.lane.b32.xlu0 %v1788_v46, %s1525_s11 }
 0x10c   : > { %v724_v43 = vpop.permute.xlu1 %723  ;;  %v821_v45 = vpop.permute.xlu2 %820 }
 0x10d   : > { %v722_v42 = vpop.permute.xlu0 %721  ;;  %v901_v44 = vld [vmem:[#allocation2 + $0x30] sm:$0xff]  ;;  %734 = vst.msk [vmem:[#allocation2 + $0x17] sm:$0x1] %vm541_vm3, %v724_v43 }
 0x10e   : > { %733 = vst.msk [vmem:[#allocation2 + $0xf] sm:$0xfe] %vm539_vm2, %v722_v42  ;;  %1273 = vmatmul.msk.f32.vlgmr.msra.gmra.mxu3 %vm908_vm10, %v901_v44 }
 0x10f   : > { %829 = vst.msk [vmem:[#allocation2 + $0x3f] sm:$0x1] %vm541_vm3, %v821_v45 }
 0x113   : > { %881 = vrot.lane.b32.xlu0 %v864_v47, %s1525_s11 }
 0x114   : > { %v564_v48 = vpop.permute.xlu1 %563  ;;  %v778_v49 = vpop.permute.xlu2 %777 }
 0x115   : > { %v745_v46 = vpop.permute.xlu0 %744  ;;  %576 = vst.msk [vmem:[#allocation2 - $0x1] sm:$0xfe] %vm575_vm5, %v564_v48 }
 0x116   : > { %750 = vst.msk [vmem:[#allocation2 + $0x10] sm:$0xff] %vm558_vm4, %v745_v46 }
 0x117   : > { %766 = vst.msk [vmem:[#allocation2 + $0xf] sm:$0xfe] %vm575_vm5, %v755_v40 }
 0x11c   : > { %v635_v51 = vpop.permute.xlu1 %634  ;;  %v602_v52 = vpop.permute.xlu2 %601 }
 0x11d   : > { %v633_v50 = vpop.permute.xlu0 %632  ;;  %643 = vst.msk [vmem:[#allocation2 + $0x2f] sm:$0x1] %vm541_vm3, %v635_v51 }
 0x11e   : > { %642 = vst.msk [vmem:[#allocation2 + $0x27] sm:$0xfe] %vm539_vm2, %v633_v50 }
 0x124   : > { %v819_v54 = vpop.permute.xlu1 %818  ;;  %v788_v55 = vpop.permute.xlu2 %787 }
 0x125   : > { %v757_v53 = vpop.permute.xlu0 %756  ;;  %828 = vst.msk [vmem:[#allocation2 + $0x37] sm:$0xfe] %vm539_vm2, %v819_v54 }
 0x126   : > { %767 = vst.msk [vmem:[#allocation2 + $0x17] sm:$0x1] %vm577_vm6, %v757_v53 }
 0x127   : > { %783 = vst.msk [vmem:[#allocation2 + $0x10] sm:$0xff] %vm594_vm7, %v778_v49 }
 0x128   : > { %799 = vst.msk [vmem:[#allocation2 + $0xf] sm:$0xfe] %vm611_vm8, %v788_v55 }
 0x12c   : > { %v654_v57 = vpop.permute.xlu1 %653  ;;  %v854_v58 = vpop.permute.xlu2 %853 }
 0x12d   : > { %v589_v56 = vpop.permute.xlu0 %588  ;;  %658 = vst.msk [vmem:[#allocation2 + $0x28] sm:$0xff] %vm558_vm4, %v654_v57 }
 0x12e   : > { %595 = vst.msk [vmem:[#allocation2] sm:$0xff] %vm594_vm7, %v589_v56 }
 0x12f   : > { %614 = vst.msk [vmem:[#allocation2 + $0x7] sm:$0x1] %vm613_vm9, %v602_v52 }
 0x134   : > { %v600_v60 = vpop.permute.xlu1 %599  ;;  %v699_v61 = vpop.permute.xlu2 %698 }
 0x135   : > { %v840_v59 = vpop.permute.xlu0 %839  ;;  %612 = vst.msk [vmem:[#allocation2 - $0x1] sm:$0xfe] %vm611_vm8, %v600_v60 }
 0x136   : > { %844 = vst.msk [vmem:[#allocation2 + $0x38] sm:$0xff] %vm558_vm4, %v840_v59 }
 0x137   : > { %862 = vst.msk [vmem:[#allocation2 + $0x3f] sm:$0x1] %vm577_vm6, %v854_v58 }
 0x13c   : > { %v668_v63 = vpop.permute.xlu1 %667  ;;  %v895_v0 = vld [vmem:[#allocation2] sm:$0xff]  ;;  %v886_v1 = vpop.permute.xlu2 %885 }
 0x13d   : > { %v666_v62 = vpop.permute.xlu0 %665  ;;  %676 = vst.msk [vmem:[#allocation2 + $0x2f] sm:$0x1] %vm577_vm6, %v668_v63  ;;  %1267 = vmatmul.msk.f32.vlgmr.msra.gmra.mxu0 %vm908_vm10, %v895_v0 }
 0x13e   : > { %675 = vst.msk [vmem:[#allocation2 + $0x27] sm:$0xfe] %vm575_vm5, %v666_v62 }
 0x144   : > { %v852_v3 = vpop.permute.xlu1 %851  ;;  %v815_v4 = vpop.permute.xlu2 %814 }
 0x145   : > { %v790_v2 = vpop.permute.xlu0 %789  ;;  %861 = vst.msk [vmem:[#allocation2 + $0x37] sm:$0xfe] %vm575_vm5, %v852_v3 }
 0x146   : > { %800 = vst.msk [vmem:[#allocation2 + $0x17] sm:$0x1] %vm613_vm9, %v790_v2 }
 0x147   : > { %826 = vst.msk [vmem:[#allocation2 + $0x17] sm:$0xfe] %vm539_vm2, %v815_v4 }
 0x14c   : > { %v872_v6 = vpop.permute.xlu1 %871  ;;  %v838_v10 = vpop.permute.xlu2 %837 }
 0x14d   : > { %v687_v5 = vpop.permute.xlu0 %686  ;;  %v897_v7 = vld [vmem:[#allocation2 + $0x10] sm:$0xff]  ;;  %876 = vst.msk [vmem:[#allocation2 + $0x38] sm:$0xff] %vm594_vm7, %v872_v6 }
 0x14e   : > { %691 = vst.msk [vmem:[#allocation2 + $0x28] sm:$0xff] %vm594_vm7, %v687_v5  ;;  %1269 = vmatmul.msk.f32.vlgmr.msra.gmra.mxu1 %vm908_vm10, %v897_v7 }
 0x14f   : > { %708 = vst.msk [vmem:[#allocation2 + $0x27] sm:$0xfe] %vm611_vm8, %v699_v61 }
 0x150   : > { %894 = vst.msk [vmem:[#allocation2 + $0x3f] sm:$0x1] %vm613_vm9, %v886_v1 }
 0x154   : > { %v884_v9 = vpop.permute.xlu1 %883  ;;  %v848_v15 = vpop.permute.xlu2 %847 }
 0x155   : > { %v701_v8 = vpop.permute.xlu0 %700  ;;  %893 = vst.msk [vmem:[#allocation2 + $0x37] sm:$0xfe] %vm611_vm8, %v884_v9 }
 0x156   : > { %709 = vst.msk [vmem:[#allocation2 + $0x2f] sm:$0x1] %vm613_vm9, %v701_v8 }
 0x15c   : > { %v631_v12 = vpop.permute.xlu1 %630  ;;  %v902_v14 = vld [vmem:[#allocation2 + $0x38] sm:$0xff]  ;;  %v870_v18 = vpop.permute.xlu2 %869 }
 0x15d   : > { %v629_v11 = vpop.permute.xlu0 %628  ;;  %v900_v13 = vld [vmem:[#allocation2 + $0x28] sm:$0xff]  ;;  %641 = vst.msk [vmem:[#allocation2 + $0xf] sm:$0x1] %vm541_vm3, %v631_v12  ;;  %1274 = vmatmul.msk.f32.gmra.mxu3 %vm908_vm10, %v902_v14 }
 0x15e   : > { %640 = vst.msk [vmem:[#allocation2 + $0x7] sm:$0xfe] %vm539_vm2, %v629_v11  ;;  %1272 = vmatmul.msk.f32.gmra.mxu2 %vm908_vm10, %v900_v13 }
 0x164   : > { %v652_v17 = vpop.permute.xlu1 %651  ;;  %v880_v23 = vpop.permute.xlu2 %879 }
 0x165   : > { %v817_v16 = vpop.permute.xlu0 %816  ;;  %657 = vst.msk [vmem:[#allocation2 + $0x8] sm:$0xff] %vm558_vm4, %v652_v17 }
 0x166   : > { %827 = vst.msk [vmem:[#allocation2 + $0x1f] sm:$0x1] %vm541_vm3, %v817_v16 }
 0x167   : > { %843 = vst.msk [vmem:[#allocation2 + $0x18] sm:$0xff] %vm558_vm4, %v838_v10 }
 0x168   : > { %859 = vst.msk [vmem:[#allocation2 + $0x17] sm:$0xfe] %vm575_vm5, %v848_v15 }
 0x16c   : > { %v664_v20 = vpop.permute.xlu1 %663 }
 0x16d   : > { %v662_v19 = vpop.permute.xlu0 %661  ;;  %674 = vst.msk [vmem:[#allocation2 + $0xf] sm:$0x1] %vm577_vm6, %v664_v20 }
 0x16e   : > { %673 = vst.msk [vmem:[#allocation2 + $0x7] sm:$0xfe] %vm575_vm5, %v662_v19 }
 0x174   : > { %v685_v22 = vpop.permute.xlu1 %684 }
 0x175   : > { %v850_v21 = vpop.permute.xlu0 %849  ;;  %690 = vst.msk [vmem:[#allocation2 + $0x8] sm:$0xff] %vm594_vm7, %v685_v22 }
 0x176   : > { %860 = vst.msk [vmem:[#allocation2 + $0x1f] sm:$0x1] %vm577_vm6, %v850_v21 }
 0x177   : > { %875 = vst.msk [vmem:[#allocation2 + $0x18] sm:$0xff] %vm594_vm7, %v870_v18 }
 0x178   : > { %891 = vst.msk [vmem:[#allocation2 + $0x17] sm:$0xfe] %vm611_vm8, %v880_v23 }
 0x17c   : > { %v697_v25 = vpop.permute.xlu1 %696 }
 0x17d   : > { %v695_v24 = vpop.permute.xlu0 %694  ;;  %707 = vst.msk [vmem:[#allocation2 + $0xf] sm:$0x1] %vm613_vm9, %v697_v25 }
 0x17e   : > { %706 = vst.msk [vmem:[#allocation2 + $0x7] sm:$0xfe] %vm611_vm8, %v695_v24 }
 0x185   : > { %v882_v26 = vpop.permute.xlu0 %881  ;;  %v896_v27 = vld [vmem:[#allocation2 + $0x8] sm:$0xff] }
 0x186   : > { %892 = vst.msk [vmem:[#allocation2 + $0x1f] sm:$0x1] %vm613_vm9, %v882_v26  ;;  %1268 = vmatmul.msk.f32.gmra.mxu0 %vm908_vm10, %v896_v27 }
 0x189   : > { %v966_v29 = vpop.f32.mrf.mxu2 }
 0x18a   : > { %v986_v30 = vadd.f32 %v1416_v28, %v966_v29 }
 0x18c   : > { %994 = vst [vmem:[%s1998_s7 + $0x20] sm:$0xff] %v986_v30 }
 0x18d   : > { %v898_v31 = vld [vmem:[#allocation2 + $0x18] sm:$0xff] }
 0x18e   : > { %1270 = vmatmul.msk.f32.gmra.mxu1 %vm908_vm10, %v898_v31 }
 0x191   : > { %v972_v32 = vpop.f32.mrf.mxu3 }
 0x192   : > { %v988_v33 = vadd.f32 %v1416_v28, %v972_v32 }
 0x193   : > { %v1058_v50 = vld [vmem:[%s1998_s7 + $0x20] sm:$0xff] (%p1608_p8) }
 0x194   : > { %996 = vst [vmem:[%s1998_s7 + $0x30] sm:$0xff] %v988_v33 }
 0x195   : > { %1059 = vst [vmem:[%s1007_s22 + $0x40] sm:$0xff] (%p1608_p8), %v1058_v50 }
 0x19b   : > { %v1062_v52 = vld [vmem:[%s1998_s7 + $0x30] sm:$0xff] (%p1608_p8) }
 0x19c   : > { %1063 = vst [vmem:[%s1007_s22 + $0x50] sm:$0xff] (%p1608_p8), %v1062_v52 }
 0x1ba   : > { %v954_v34 = vpop.f32.mrf.mxu0 }
 0x1bb   : > { %v982_v35 = vadd.f32 %v1416_v28, %v954_v34 }
 0x1bd   : > { %990 = vst [vmem:[%s1998_s7] sm:$0xff] %v982_v35 }
 0x1c4   : > { %v1050_v47 = vld [vmem:[%s1998_s7] sm:$0xff] (%p1608_p8) }
 0x1c5   : > { %1051 = vst [vmem:[%s1007_s22] sm:$0xff] (%p1608_p8), %v1050_v47 }
 0x1cb   : > { %v960_v36 = vpop.f32.mrf.mxu1 }
 0x1cc   : > { %v984_v37 = vadd.f32 %v1416_v28, %v960_v36 }
 0x1ce   : > { %992 = vst [vmem:[%s1998_s7 + $0x10] sm:$0xff] %v984_v37 }
 0x1d5   : > { %v1054_v48 = vld [vmem:[%s1998_s7 + $0x10] sm:$0xff] (%p1608_p8) }
 0x1d6   : > { %1055 = vst [vmem:[%s1007_s22 + $0x10] sm:$0xff] (%p1608_p8), %v1054_v48 }
 0x1e0   : > { %v975_v40 = vpop.f32.mrf.mxu3 }
 0x1e1   : > { %v969_v38 = vpop.f32.mrf.mxu2  ;;  %v989_v41 = vadd.f32 %v1416_v28, %v975_v40 }
 0x1e2   : > { %v987_v39 = vadd.f32 %v1416_v28, %v969_v38 }
 0x1e3   : > { %997 = vst [vmem:[%s1998_s7 + $0x38] sm:$0xff] %v989_v41 }
 0x1e4   : > { %995 = vst [vmem:[%s1998_s7 + $0x28] sm:$0xff] %v987_v39 }
 0x1ea   : > { %v1064_v53 = vld [vmem:[%s1998_s7 + $0x38] sm:$0xff] (%p1608_p8) }
 0x1eb   : > { %v1060_v51 = vld [vmem:[%s1998_s7 + $0x28] sm:$0xff] (%p1608_p8)  ;;  %1065 = vst [vmem:[%s1007_s22 + $0x58] sm:$0xff] (%p1608_p8), %v1064_v53 }
 0x1ec   : > { %1061 = vst [vmem:[%s1007_s22 + $0x48] sm:$0xff] (%p1608_p8), %v1060_v51 }
 0x203   : > { %v957_v42 = vpop.f32.mrf.mxu0 }
 0x204   : > { %v983_v43 = vadd.f32 %v1416_v28, %v957_v42 }
 0x206   : > { %991 = vst [vmem:[%s1998_s7 + $0x8] sm:$0xff] %v983_v43 }
 0x20a   : > { %1004 = sbr.rel (!%p1608_p8) target bundleno = 535 (0x217), region = 130 }
 0x20b   : > { %v963_v44 = vpop.f32.mrf.mxu1 }
 0x20c   : > { %v985_v45 = vadd.f32 %v1416_v28, %v963_v44 }
 0x20d   : > { %v1052_v46 = vld [vmem:[%s1998_s7 + $0x8] sm:$0xff] (%p1608_p8) }
 0x20e   : > { %993 = vst [vmem:[%s1998_s7 + $0x18] sm:$0xff] %v985_v45 }
 0x20f   : > { %1053 = vst [vmem:[%s1007_s22 + $0x8] sm:$0xff] %v1052_v46 }
 0x215   : > { %v1056_v49 = vld [vmem:[%s1998_s7 + $0x18] sm:$0xff] }
 0x216   : > { %1057 = vst [vmem:[%s1007_s22 + $0x18] sm:$0xff] %v1056_v49 }
 0x217 PF: > { %p11_p7 = scmp.ge.s32.totalorder %s1578_s21, 4   ;;  %s2054_s15 = smov %s1475_s16 }
 0x218   : > { %s2055_s16 = smov %s1603_s5  ;;  %s2056_s17 = smov %s1483_s18 }
 0x219   : > { %s2057_s18 = smov %s1588_s25  ;;  %s2058_s19 = smov %s1578_s21 }
 0x21a   :  { %13 = sbr.rel (!%p11_p7) target bundleno = 3 (0x3), region = 247 }

</bundles_post_ra>
